<compile_context>
chip_gen: v5e
topology: v5e:2x2
jax: 0.10.0
libtpu: 0.0.40
codegen_flags: <defaults>
</compile_context>

<pallas_src>
import functools

import jax
import jax.numpy as jnp
from jax.experimental import pallas as pl
from jax.experimental.pallas import tpu as pltpu

EPS = 1e-5                     # F.layer_norm default epsilon
COMPUTE_DTYPE = jnp.bfloat16   # MXU operand dtype (accumulation stays f32)
NEG_BIG = -1.0e30              # masked-out value for max-pool (post-ReLU data >= 0)


def _dot(a, b):
    # MXU matmul: bf16 operands, f32 accumulation.
    return jnp.dot(a.astype(COMPUTE_DTYPE), b.astype(COMPUTE_DTYPE),
                   preferred_element_type=jnp.float32)


def _ln_relu(h, mask, n_real):
    # h: (tb, n, F) f32.  F.layer_norm(x, x.size()[1:]) normalizes each
    # polyline's (n, F) slab jointly: biased variance, eps=1e-5, no affine.
    # `mask` is None when n == n_real; otherwise a (tb, n, 1) bool marking real
    # rows.  Padded rows are zeroed before the statistics; their normalized
    # values are garbage but every downstream consumer re-masks them.
    # Fused single pass: var = E[x^2] - E[x]^2 (clamped for fp safety). Then ReLU.
    tb, n, f = h.shape
    if mask is not None:
        h = jnp.where(mask, h, 0.0)
    inv = 1.0 / (n_real * f)
    s1 = jnp.sum(jnp.sum(h, axis=2, keepdims=True), axis=1, keepdims=True)
    s2 = jnp.sum(jnp.sum(h * h, axis=2, keepdims=True), axis=1, keepdims=True)
    mu = s1 * inv
    var = jnp.maximum(s2 * inv - mu * mu, 0.0)
    return jnp.maximum((h - mu) * jax.lax.rsqrt(var + EPS), 0.0)


def _encode(h, w2_ref, b2, mask, n_real):
    # relu(LN(h)) -> Linear(64->128) -> relu(LN) -> per-polyline max-pool.
    tb, n, f = h.shape
    h = _ln_relu(h, mask, n_real)
    h2 = _dot(h.reshape(tb * n, f), w2_ref[...]) + b2
    e = _ln_relu(h2.reshape(tb, n, 128), mask, n_real)   # encode_data (tb,n,128)
    if mask is not None:
        p = jnp.max(jnp.where(mask, e, NEG_BIG), axis=1)  # pooled (tb,128)
    else:
        p = jnp.max(e, axis=1)
    return e, p


def _mid_layer(e, p, w1_ref, b1, w2_ref, b2, mask, n_real):
    # Linear(256->64) applied to concat([e, broadcast(p)], -1) WITHOUT
    # materializing the concat/broadcast: the (256,64) weight is split at an
    # aligned static boundary into encode (0:128) and pooled (128:256) halves.
    tb, n, _ = e.shape
    h = _dot(e.reshape(tb * n, 128), w1_ref[0:128, :]).reshape(tb, n, 64)
    h = h + _dot(p, w1_ref[128:256, :])[:, None, :] + b1
    return _encode(h, w2_ref, b2, mask, n_real)


def _subgraphnet_kernel(n_real, x_ref, w1a_ref, w2a_ref, w1b_ref, w2b_ref,
                        w1c_ref, w2c_ref, bias_ref, out_ref):
    tb, n, c = x_ref.shape

    # Row-validity mask, only materialized if N was padded to a sublane multiple.
    if n != n_real:
        row = jax.lax.broadcasted_iota(jnp.int32, (tb, n, 1), 1)
        mask = row < n_real
    else:
        mask = None

    b = bias_ref[...]                                  # (6, 128) f32 bias pack
    b1a, b2a = b[0:1, 0:64], b[1:2, :]
    b1b, b2b = b[2:3, 0:64], b[3:4, :]
    b1c, b2c = b[4:5, 0:64], b[5:6, :]

    # ---- layer 1: Linear(C->64) ----
    x = x_ref[...].reshape(tb * n, c)                  # free: n is a multiple of 8
    h = (_dot(x, w1a_ref[...]) + b1a).reshape(tb, n, 64)
    e, p = _encode(h, w2a_ref, b2a, mask, n_real)
    # ---- layer 2 ----
    e, p = _mid_layer(e, p, w1b_ref, b1b, w2b_ref, b2b, mask, n_real)
    # ---- layer 3: only the pooled vector reaches the final output ----
    _, p = _mid_layer(e, p, w1c_ref, b1c, w2c_ref, b2c, mask, n_real)

    # max over N of concat(e3, broadcast(max_N e3)) == [p3, p3] (exact identity),
    # so the (N,256) concat and the final max-pool are skipped. Lane-dense,
    # 128-aligned stores into the (tb, 256) output slab.
    out_ref[0, :, 0:128] = p
    out_ref[0, :, 128:256] = p


def subgraph_net(x, params):
    """x: (B, N, C) float32 or bfloat16; params: 3 tuples (w1^T, b1, w2^T, b2).

    Returns (B, 256) float32.
    """
    B, N, C = x.shape

    # Pad N (sublane axis) up to a multiple of 8 so in-kernel reshapes never
    # cross (8,128) tile boundaries; padded rows are masked out of LN stats and
    # the max-pool inside the kernel.
    n_pad = -(-N // 8) * 8

    # Batch tiling: ~2048 matmul rows per grid step (sweep 2048..4096 if
    # profiling shows the pipeline still exposed). Only split into multiple
    # blocks when every block still carries a full target's worth of rows --
    # for small B a single well-shaped block beats degenerate splits, even with
    # two TensorCores (v7x).
    tb_target = max(1, 2048 // n_pad)
    if B >= 2 * tb_target:
        tb = tb_target
        nblocks = -(-B // tb)
    else:
        tb = B
        nblocks = 1
    b_pad = nblocks * tb

    if b_pad != B or n_pad != N:
        # Zero padding is numerically safe: padded polylines are dropped at the
        # end; padded rows are excluded from LN stats / max-pool in-kernel.
        x = jnp.pad(x, ((0, b_pad - B), (0, n_pad - N), (0, 0)))

    (w1a, b1a, w2a, b2a), (w1b, b1b, w2b, b2b), (w1c, b1c, w2c, b2c) = params
    cd = COMPUTE_DTYPE
    weights = [w1a.astype(cd), w2a.astype(cd),
               w1b.astype(cd), w2b.astype(cd),
               w1c.astype(cd), w2c.astype(cd)]

    # Pack the six tiny biases into one (6, 128) f32 array: collapses six
    # constant DMA streams into one.
    bias_pack = jnp.zeros((6, 128), jnp.float32)
    bias_pack = (bias_pack.at[0, :64].set(b1a).at[1, :].set(b2a)
                          .at[2, :64].set(b1b).at[3, :].set(b2b)
                          .at[4, :64].set(b1c).at[5, :].set(b2c))

    def const_spec(a):
        # Weights/bias pack: full block, constant index map (VMEM-resident).
        return pl.BlockSpec(a.shape, lambda b: (0, 0))

    in_specs = [pl.BlockSpec((tb, n_pad, C), lambda b: (b, 0, 0))]
    in_specs += [const_spec(a) for a in weights]
    in_specs += [const_spec(bias_pack)]

    out = pl.pallas_call(
        functools.partial(_subgraphnet_kernel, N),
        out_shape=jax.ShapeDtypeStruct((nblocks, tb, 256), jnp.float32),
        grid=(nblocks,),
        in_specs=in_specs,
        # Block's last two dims equal the array's last two -> dense, full-lane
        # (tb, 256) stores each grid step.
        out_specs=pl.BlockSpec((1, tb, 256), lambda b: (b, 0, 0)),
        compiler_params=pltpu.CompilerParams(
            dimension_semantics=("parallel",),
            # Headroom over the 16 MiB (v5e) / 32 MiB (v6e,v7x) scoped-VMEM
            # defaults for the ~2-4K-row blocks; below v7x's 64 MiB physical.
            vmem_limit_bytes=48 * 1024 * 1024),
    )(x, *weights, bias_pack)
    return out.reshape(b_pad, 256)[:B]                 # (B, 256)


def init_params(key, input_channels):
    """Deterministic synthetic init matching the PyTorch module's shapes.

    nn.Linear weight (out, in) with kaiming_normal_ (std = sqrt(2/fan_in));
    bias uniform(-1/sqrt(fan_in), 1/sqrt(fan_in)). We store W^T (in, out) so
    the kernel does x @ W^T + b; biases are 1-D (out,).
    """
    layer_dims = [(input_channels, 64, 128), (256, 64, 128), (256, 64, 128)]
    params = []
    for (cin, hid, cout) in layer_dims:
        key, k1, k2, k3, k4 = jax.random.split(key, 5)
        w1 = jax.random.normal(k1, (hid, cin), jnp.float32) * jnp.sqrt(2.0 / cin)
        b1 = jax.random.uniform(k2, (hid,), jnp.float32,
                                -1.0 / jnp.sqrt(cin), 1.0 / jnp.sqrt(cin))
        w2 = jax.random.normal(k3, (cout, hid), jnp.float32) * jnp.sqrt(2.0 / hid)
        b2 = jax.random.uniform(k4, (cout,), jnp.float32,
                                -1.0 / jnp.sqrt(hid), 1.0 / jnp.sqrt(hid))
        params.append((w1.T, b1, w2.T, b2))
    return params


if __name__ == "__main__":
    key = jax.random.PRNGKey(0)
    B, N, C_IN = 2, 8, 16          # batch, points-per-polyline, input channels
    kx, kp = jax.random.split(key)
    x = jax.random.normal(kx, (B, N, C_IN), jnp.float32)
    params = init_params(kp, C_IN)

    out = subgraph_net(x, params)
    out = jax.block_until_ready(out)
    assert out.shape == (B, 256), out.shape
    assert bool(jnp.all(jnp.isfinite(out)))
    print("KERNEL_OK")
</pallas_src>

<mosaic_0001>
module attributes {stable_mosaic.version = 11 : i64} {
  func.func @_subgraphnet_kernel(%arg0: i32, %arg1: memref<2x8x16xf32, #tpu.memory_space<vmem>>, %arg2: memref<16x64xbf16, #tpu.memory_space<vmem>>, %arg3: memref<64x128xbf16, #tpu.memory_space<vmem>>, %arg4: memref<256x64xbf16, #tpu.memory_space<vmem>>, %arg5: memref<64x128xbf16, #tpu.memory_space<vmem>>, %arg6: memref<256x64xbf16, #tpu.memory_space<vmem>>, %arg7: memref<64x128xbf16, #tpu.memory_space<vmem>>, %arg8: memref<6x128xf32, #tpu.memory_space<vmem>>, %arg9: memref<1x2x256xf32, #tpu.memory_space<vmem>>) attributes {dimension_semantics = [#tpu.dimension_semantics<parallel>], iteration_bounds = array<i64: 1>, scalar_prefetch = 0 : i64, scratch_operands = 0 : i64, tpu.core_type = #tpu.core_type<tc>, window_params = [{transform_indices = @transform_0, window_bounds = array<i64: 2, 8, 16>}, {pipeline_mode = #tpu.pipeline_mode<synchronous>, transform_indices = @transform_1, window_bounds = array<i64: 16, 64>}, {pipeline_mode = #tpu.pipeline_mode<synchronous>, transform_indices = @transform_2, window_bounds = array<i64: 64, 128>}, {pipeline_mode = #tpu.pipeline_mode<synchronous>, transform_indices = @transform_3, window_bounds = array<i64: 256, 64>}, {pipeline_mode = #tpu.pipeline_mode<synchronous>, transform_indices = @transform_4, window_bounds = array<i64: 64, 128>}, {pipeline_mode = #tpu.pipeline_mode<synchronous>, transform_indices = @transform_5, window_bounds = array<i64: 256, 64>}, {pipeline_mode = #tpu.pipeline_mode<synchronous>, transform_indices = @transform_6, window_bounds = array<i64: 64, 128>}, {pipeline_mode = #tpu.pipeline_mode<synchronous>, transform_indices = @transform_7, window_bounds = array<i64: 6, 128>}, {transform_indices = @transform_8, window_bounds = array<i64: 1, 2, 256>}]} {
    %c0 = arith.constant 0 : index
    %c0_0 = arith.constant 0 : index
    %0 = vector.load %arg8[%c0, %c0_0] : memref<6x128xf32, #tpu.memory_space<vmem>>, vector<6x128xf32>
    %1 = vector.extract_strided_slice %0 {offsets = [0, 0], sizes = [1, 64], strides = [1, 1]} : vector<6x128xf32> to vector<1x64xf32>
    %2 = vector.extract_strided_slice %0 {offsets = [1, 0], sizes = [1, 128], strides = [1, 1]} : vector<6x128xf32> to vector<1x128xf32>
    %3 = vector.extract_strided_slice %0 {offsets = [2, 0], sizes = [1, 64], strides = [1, 1]} : vector<6x128xf32> to vector<1x64xf32>
    %4 = vector.extract_strided_slice %0 {offsets = [3, 0], sizes = [1, 128], strides = [1, 1]} : vector<6x128xf32> to vector<1x128xf32>
    %5 = vector.extract_strided_slice %0 {offsets = [4, 0], sizes = [1, 64], strides = [1, 1]} : vector<6x128xf32> to vector<1x64xf32>
    %6 = vector.extract_strided_slice %0 {offsets = [5, 0], sizes = [1, 128], strides = [1, 1]} : vector<6x128xf32> to vector<1x128xf32>
    %c0_1 = arith.constant 0 : index
    %c0_2 = arith.constant 0 : index
    %c0_3 = arith.constant 0 : index
    %7 = vector.load %arg1[%c0_1, %c0_2, %c0_3] : memref<2x8x16xf32, #tpu.memory_space<vmem>>, vector<2x8x16xf32>
    %8 = vector.shape_cast %7 : vector<2x8x16xf32> to vector<16x16xf32>
    %c0_4 = arith.constant 0 : index
    %c0_5 = arith.constant 0 : index
    %9 = vector.load %arg2[%c0_4, %c0_5] : memref<16x64xbf16, #tpu.memory_space<vmem>>, vector<16x64xbf16>
    %10 = arith.truncf %8 : vector<16x16xf32> to vector<16x16xbf16>
    %cst = arith.constant dense<0.000000e+00> : vector<16x64xf32>
    %11 = tpu.matmul %10, %9, %cst {dimension_numbers = #tpu.dot_dimension_numbers<[1], [0], [0], [1], [0, 0, 1, 1], [], []>} : vector<16x16xbf16>, vector<16x64xbf16>, vector<16x64xf32> -> vector<16x64xf32>
    %12 = vector.broadcast %1 : vector<1x64xf32> to vector<16x64xf32>
    %13 = arith.addf %11, %12 : vector<16x64xf32>
    %14 = vector.shape_cast %13 : vector<16x64xf32> to vector<2x8x64xf32>
    %cst_6 = arith.constant dense<0.000000e+00> : vector<2x8xf32>
    %15 = vector.multi_reduction <add>, %14, %cst_6 [2] : vector<2x8x64xf32> to vector<2x8xf32>
    %16 = vector.shape_cast %15 : vector<2x8xf32> to vector<2x8x1xf32>
    %cst_7 = arith.constant dense<0.000000e+00> : vector<2x1xf32>
    %17 = vector.multi_reduction <add>, %16, %cst_7 [1] : vector<2x8x1xf32> to vector<2x1xf32>
    %18 = vector.shape_cast %17 : vector<2x1xf32> to vector<2x1x1xf32>
    %19 = arith.mulf %14, %14 : vector<2x8x64xf32>
    %cst_8 = arith.constant dense<0.000000e+00> : vector<2x8xf32>
    %20 = vector.multi_reduction <add>, %19, %cst_8 [2] : vector<2x8x64xf32> to vector<2x8xf32>
    %21 = vector.shape_cast %20 : vector<2x8xf32> to vector<2x8x1xf32>
    %cst_9 = arith.constant dense<0.000000e+00> : vector<2x1xf32>
    %22 = vector.multi_reduction <add>, %21, %cst_9 [1] : vector<2x8x1xf32> to vector<2x1xf32>
    %23 = vector.shape_cast %22 : vector<2x1xf32> to vector<2x1x1xf32>
    %cst_10 = arith.constant 0.001953125 : f32
    %24 = vector.broadcast %cst_10 : f32 to vector<2x1x1xf32>
    %25 = arith.mulf %18, %24 : vector<2x1x1xf32>
    %cst_11 = arith.constant 0.001953125 : f32
    %26 = vector.broadcast %cst_11 : f32 to vector<2x1x1xf32>
    %27 = arith.mulf %23, %26 : vector<2x1x1xf32>
    %28 = arith.mulf %25, %25 : vector<2x1x1xf32>
    %29 = arith.subf %27, %28 : vector<2x1x1xf32>
    %cst_12 = arith.constant 0.000000e+00 : f32
    %30 = vector.broadcast %cst_12 : f32 to vector<2x1x1xf32>
    %31 = arith.maximumf %29, %30 : vector<2x1x1xf32>
    %32 = vector.broadcast %25 : vector<2x1x1xf32> to vector<2x8x64xf32>
    %33 = arith.subf %14, %32 : vector<2x8x64xf32>
    %cst_13 = arith.constant 9.99999974E-6 : f32
    %34 = vector.broadcast %cst_13 : f32 to vector<2x1x1xf32>
    %35 = arith.addf %31, %34 : vector<2x1x1xf32>
    %36 = math.rsqrt %35 : vector<2x1x1xf32>
    %37 = vector.broadcast %36 : vector<2x1x1xf32> to vector<2x8x64xf32>
    %38 = arith.mulf %33, %37 : vector<2x8x64xf32>
    %cst_14 = arith.constant 0.000000e+00 : f32
    %39 = vector.broadcast %cst_14 : f32 to vector<2x8x64xf32>
    %40 = arith.maximumf %38, %39 : vector<2x8x64xf32>
    %41 = vector.shape_cast %40 : vector<2x8x64xf32> to vector<16x64xf32>
    %c0_15 = arith.constant 0 : index
    %c0_16 = arith.constant 0 : index
    %42 = vector.load %arg3[%c0_15, %c0_16] : memref<64x128xbf16, #tpu.memory_space<vmem>>, vector<64x128xbf16>
    %43 = arith.truncf %41 : vector<16x64xf32> to vector<16x64xbf16>
    %cst_17 = arith.constant dense<0.000000e+00> : vector<16x128xf32>
    %44 = tpu.matmul %43, %42, %cst_17 {dimension_numbers = #tpu.dot_dimension_numbers<[1], [0], [0], [1], [0, 0, 1, 1], [], []>} : vector<16x64xbf16>, vector<64x128xbf16>, vector<16x128xf32> -> vector<16x128xf32>
    %45 = vector.broadcast %2 : vector<1x128xf32> to vector<16x128xf32>
    %46 = arith.addf %44, %45 : vector<16x128xf32>
    %47 = vector.shape_cast %46 : vector<16x128xf32> to vector<2x8x128xf32>
    %cst_18 = arith.constant dense<0.000000e+00> : vector<2x8xf32>
    %48 = vector.multi_reduction <add>, %47, %cst_18 [2] : vector<2x8x128xf32> to vector<2x8xf32>
    %49 = vector.shape_cast %48 : vector<2x8xf32> to vector<2x8x1xf32>
    %cst_19 = arith.constant dense<0.000000e+00> : vector<2x1xf32>
    %50 = vector.multi_reduction <add>, %49, %cst_19 [1] : vector<2x8x1xf32> to vector<2x1xf32>
    %51 = vector.shape_cast %50 : vector<2x1xf32> to vector<2x1x1xf32>
    %52 = arith.mulf %47, %47 : vector<2x8x128xf32>
    %cst_20 = arith.constant dense<0.000000e+00> : vector<2x8xf32>
    %53 = vector.multi_reduction <add>, %52, %cst_20 [2] : vector<2x8x128xf32> to vector<2x8xf32>
    %54 = vector.shape_cast %53 : vector<2x8xf32> to vector<2x8x1xf32>
    %cst_21 = arith.constant dense<0.000000e+00> : vector<2x1xf32>
    %55 = vector.multi_reduction <add>, %54, %cst_21 [1] : vector<2x8x1xf32> to vector<2x1xf32>
    %56 = vector.shape_cast %55 : vector<2x1xf32> to vector<2x1x1xf32>
    %cst_22 = arith.constant 9.765625E-4 : f32
    %57 = vector.broadcast %cst_22 : f32 to vector<2x1x1xf32>
    %58 = arith.mulf %51, %57 : vector<2x1x1xf32>
    %cst_23 = arith.constant 9.765625E-4 : f32
    %59 = vector.broadcast %cst_23 : f32 to vector<2x1x1xf32>
    %60 = arith.mulf %56, %59 : vector<2x1x1xf32>
    %61 = arith.mulf %58, %58 : vector<2x1x1xf32>
    %62 = arith.subf %60, %61 : vector<2x1x1xf32>
    %cst_24 = arith.constant 0.000000e+00 : f32
    %63 = vector.broadcast %cst_24 : f32 to vector<2x1x1xf32>
    %64 = arith.maximumf %62, %63 : vector<2x1x1xf32>
    %65 = vector.broadcast %58 : vector<2x1x1xf32> to vector<2x8x128xf32>
    %66 = arith.subf %47, %65 : vector<2x8x128xf32>
    %cst_25 = arith.constant 9.99999974E-6 : f32
    %67 = vector.broadcast %cst_25 : f32 to vector<2x1x1xf32>
    %68 = arith.addf %64, %67 : vector<2x1x1xf32>
    %69 = math.rsqrt %68 : vector<2x1x1xf32>
    %70 = vector.broadcast %69 : vector<2x1x1xf32> to vector<2x8x128xf32>
    %71 = arith.mulf %66, %70 : vector<2x8x128xf32>
    %cst_26 = arith.constant 0.000000e+00 : f32
    %72 = vector.broadcast %cst_26 : f32 to vector<2x8x128xf32>
    %73 = arith.maximumf %71, %72 : vector<2x8x128xf32>
    %cst_27 = arith.constant dense<0xFF800000> : vector<2x128xf32>
    %74 = vector.multi_reduction <maximumf>, %73, %cst_27 [1] : vector<2x8x128xf32> to vector<2x128xf32>
    %75 = vector.shape_cast %73 : vector<2x8x128xf32> to vector<16x128xf32>
    %c0_28 = arith.constant 0 : index
    %c0_29 = arith.constant 0 : index
    %76 = vector.load %arg4[%c0_28, %c0_29] : memref<256x64xbf16, #tpu.memory_space<vmem>>, vector<128x64xbf16>
    %77 = arith.truncf %75 : vector<16x128xf32> to vector<16x128xbf16>
    %cst_30 = arith.constant dense<0.000000e+00> : vector<16x64xf32>
    %78 = tpu.matmul %77, %76, %cst_30 {dimension_numbers = #tpu.dot_dimension_numbers<[1], [0], [0], [1], [0, 0, 1, 1], [], []>} : vector<16x128xbf16>, vector<128x64xbf16>, vector<16x64xf32> -> vector<16x64xf32>
    %79 = vector.shape_cast %78 : vector<16x64xf32> to vector<2x8x64xf32>
    %c128 = arith.constant 128 : index
    %c0_31 = arith.constant 0 : index
    %80 = vector.load %arg4[%c128, %c0_31] : memref<256x64xbf16, #tpu.memory_space<vmem>>, vector<128x64xbf16>
    %81 = arith.truncf %74 : vector<2x128xf32> to vector<2x128xbf16>
    %cst_32 = arith.constant dense<0.000000e+00> : vector<2x64xf32>
    %82 = tpu.matmul %81, %80, %cst_32 {dimension_numbers = #tpu.dot_dimension_numbers<[1], [0], [0], [1], [0, 0, 1, 1], [], []>} : vector<2x128xbf16>, vector<128x64xbf16>, vector<2x64xf32> -> vector<2x64xf32>
    %83 = vector.shape_cast %82 : vector<2x64xf32> to vector<2x1x64xf32>
    %84 = vector.broadcast %83 : vector<2x1x64xf32> to vector<2x8x64xf32>
    %85 = arith.addf %79, %84 : vector<2x8x64xf32>
    %86 = vector.shape_cast %3 : vector<1x64xf32> to vector<1x1x64xf32>
    %87 = vector.broadcast %86 : vector<1x1x64xf32> to vector<2x8x64xf32>
    %88 = arith.addf %85, %87 : vector<2x8x64xf32>
    %cst_33 = arith.constant dense<0.000000e+00> : vector<2x8xf32>
    %89 = vector.multi_reduction <add>, %88, %cst_33 [2] : vector<2x8x64xf32> to vector<2x8xf32>
    %90 = vector.shape_cast %89 : vector<2x8xf32> to vector<2x8x1xf32>
    %cst_34 = arith.constant dense<0.000000e+00> : vector<2x1xf32>
    %91 = vector.multi_reduction <add>, %90, %cst_34 [1] : vector<2x8x1xf32> to vector<2x1xf32>
    %92 = vector.shape_cast %91 : vector<2x1xf32> to vector<2x1x1xf32>
    %93 = arith.mulf %88, %88 : vector<2x8x64xf32>
    %cst_35 = arith.constant dense<0.000000e+00> : vector<2x8xf32>
    %94 = vector.multi_reduction <add>, %93, %cst_35 [2] : vector<2x8x64xf32> to vector<2x8xf32>
    %95 = vector.shape_cast %94 : vector<2x8xf32> to vector<2x8x1xf32>
    %cst_36 = arith.constant dense<0.000000e+00> : vector<2x1xf32>
    %96 = vector.multi_reduction <add>, %95, %cst_36 [1] : vector<2x8x1xf32> to vector<2x1xf32>
    %97 = vector.shape_cast %96 : vector<2x1xf32> to vector<2x1x1xf32>
    %cst_37 = arith.constant 0.001953125 : f32
    %98 = vector.broadcast %cst_37 : f32 to vector<2x1x1xf32>
    %99 = arith.mulf %92, %98 : vector<2x1x1xf32>
    %cst_38 = arith.constant 0.001953125 : f32
    %100 = vector.broadcast %cst_38 : f32 to vector<2x1x1xf32>
    %101 = arith.mulf %97, %100 : vector<2x1x1xf32>
    %102 = arith.mulf %99, %99 : vector<2x1x1xf32>
    %103 = arith.subf %101, %102 : vector<2x1x1xf32>
    %cst_39 = arith.constant 0.000000e+00 : f32
    %104 = vector.broadcast %cst_39 : f32 to vector<2x1x1xf32>
    %105 = arith.maximumf %103, %104 : vector<2x1x1xf32>
    %106 = vector.broadcast %99 : vector<2x1x1xf32> to vector<2x8x64xf32>
    %107 = arith.subf %88, %106 : vector<2x8x64xf32>
    %cst_40 = arith.constant 9.99999974E-6 : f32
    %108 = vector.broadcast %cst_40 : f32 to vector<2x1x1xf32>
    %109 = arith.addf %105, %108 : vector<2x1x1xf32>
    %110 = math.rsqrt %109 : vector<2x1x1xf32>
    %111 = vector.broadcast %110 : vector<2x1x1xf32> to vector<2x8x64xf32>
    %112 = arith.mulf %107, %111 : vector<2x8x64xf32>
    %cst_41 = arith.constant 0.000000e+00 : f32
    %113 = vector.broadcast %cst_41 : f32 to vector<2x8x64xf32>
    %114 = arith.maximumf %112, %113 : vector<2x8x64xf32>
    %115 = vector.shape_cast %114 : vector<2x8x64xf32> to vector<16x64xf32>
    %c0_42 = arith.constant 0 : index
    %c0_43 = arith.constant 0 : index
    %116 = vector.load %arg5[%c0_42, %c0_43] : memref<64x128xbf16, #tpu.memory_space<vmem>>, vector<64x128xbf16>
    %117 = arith.truncf %115 : vector<16x64xf32> to vector<16x64xbf16>
    %cst_44 = arith.constant dense<0.000000e+00> : vector<16x128xf32>
    %118 = tpu.matmul %117, %116, %cst_44 {dimension_numbers = #tpu.dot_dimension_numbers<[1], [0], [0], [1], [0, 0, 1, 1], [], []>} : vector<16x64xbf16>, vector<64x128xbf16>, vector<16x128xf32> -> vector<16x128xf32>
    %119 = vector.broadcast %4 : vector<1x128xf32> to vector<16x128xf32>
    %120 = arith.addf %118, %119 : vector<16x128xf32>
    %121 = vector.shape_cast %120 : vector<16x128xf32> to vector<2x8x128xf32>
    %cst_45 = arith.constant dense<0.000000e+00> : vector<2x8xf32>
    %122 = vector.multi_reduction <add>, %121, %cst_45 [2] : vector<2x8x128xf32> to vector<2x8xf32>
    %123 = vector.shape_cast %122 : vector<2x8xf32> to vector<2x8x1xf32>
    %cst_46 = arith.constant dense<0.000000e+00> : vector<2x1xf32>
    %124 = vector.multi_reduction <add>, %123, %cst_46 [1] : vector<2x8x1xf32> to vector<2x1xf32>
    %125 = vector.shape_cast %124 : vector<2x1xf32> to vector<2x1x1xf32>
    %126 = arith.mulf %121, %121 : vector<2x8x128xf32>
    %cst_47 = arith.constant dense<0.000000e+00> : vector<2x8xf32>
    %127 = vector.multi_reduction <add>, %126, %cst_47 [2] : vector<2x8x128xf32> to vector<2x8xf32>
    %128 = vector.shape_cast %127 : vector<2x8xf32> to vector<2x8x1xf32>
    %cst_48 = arith.constant dense<0.000000e+00> : vector<2x1xf32>
    %129 = vector.multi_reduction <add>, %128, %cst_48 [1] : vector<2x8x1xf32> to vector<2x1xf32>
    %130 = vector.shape_cast %129 : vector<2x1xf32> to vector<2x1x1xf32>
    %cst_49 = arith.constant 9.765625E-4 : f32
    %131 = vector.broadcast %cst_49 : f32 to vector<2x1x1xf32>
    %132 = arith.mulf %125, %131 : vector<2x1x1xf32>
    %cst_50 = arith.constant 9.765625E-4 : f32
    %133 = vector.broadcast %cst_50 : f32 to vector<2x1x1xf32>
    %134 = arith.mulf %130, %133 : vector<2x1x1xf32>
    %135 = arith.mulf %132, %132 : vector<2x1x1xf32>
    %136 = arith.subf %134, %135 : vector<2x1x1xf32>
    %cst_51 = arith.constant 0.000000e+00 : f32
    %137 = vector.broadcast %cst_51 : f32 to vector<2x1x1xf32>
    %138 = arith.maximumf %136, %137 : vector<2x1x1xf32>
    %139 = vector.broadcast %132 : vector<2x1x1xf32> to vector<2x8x128xf32>
    %140 = arith.subf %121, %139 : vector<2x8x128xf32>
    %cst_52 = arith.constant 9.99999974E-6 : f32
    %141 = vector.broadcast %cst_52 : f32 to vector<2x1x1xf32>
    %142 = arith.addf %138, %141 : vector<2x1x1xf32>
    %143 = math.rsqrt %142 : vector<2x1x1xf32>
    %144 = vector.broadcast %143 : vector<2x1x1xf32> to vector<2x8x128xf32>
    %145 = arith.mulf %140, %144 : vector<2x8x128xf32>
    %cst_53 = arith.constant 0.000000e+00 : f32
    %146 = vector.broadcast %cst_53 : f32 to vector<2x8x128xf32>
    %147 = arith.maximumf %145, %146 : vector<2x8x128xf32>
    %cst_54 = arith.constant dense<0xFF800000> : vector<2x128xf32>
    %148 = vector.multi_reduction <maximumf>, %147, %cst_54 [1] : vector<2x8x128xf32> to vector<2x128xf32>
    %149 = vector.shape_cast %147 : vector<2x8x128xf32> to vector<16x128xf32>
    %c0_55 = arith.constant 0 : index
    %c0_56 = arith.constant 0 : index
    %150 = vector.load %arg6[%c0_55, %c0_56] : memref<256x64xbf16, #tpu.memory_space<vmem>>, vector<128x64xbf16>
    %151 = arith.truncf %149 : vector<16x128xf32> to vector<16x128xbf16>
    %cst_57 = arith.constant dense<0.000000e+00> : vector<16x64xf32>
    %152 = tpu.matmul %151, %150, %cst_57 {dimension_numbers = #tpu.dot_dimension_numbers<[1], [0], [0], [1], [0, 0, 1, 1], [], []>} : vector<16x128xbf16>, vector<128x64xbf16>, vector<16x64xf32> -> vector<16x64xf32>
    %153 = vector.shape_cast %152 : vector<16x64xf32> to vector<2x8x64xf32>
    %c128_58 = arith.constant 128 : index
    %c0_59 = arith.constant 0 : index
    %154 = vector.load %arg6[%c128_58, %c0_59] : memref<256x64xbf16, #tpu.memory_space<vmem>>, vector<128x64xbf16>
    %155 = arith.truncf %148 : vector<2x128xf32> to vector<2x128xbf16>
    %cst_60 = arith.constant dense<0.000000e+00> : vector<2x64xf32>
    %156 = tpu.matmul %155, %154, %cst_60 {dimension_numbers = #tpu.dot_dimension_numbers<[1], [0], [0], [1], [0, 0, 1, 1], [], []>} : vector<2x128xbf16>, vector<128x64xbf16>, vector<2x64xf32> -> vector<2x64xf32>
    %157 = vector.shape_cast %156 : vector<2x64xf32> to vector<2x1x64xf32>
    %158 = vector.broadcast %157 : vector<2x1x64xf32> to vector<2x8x64xf32>
    %159 = arith.addf %153, %158 : vector<2x8x64xf32>
    %160 = vector.shape_cast %5 : vector<1x64xf32> to vector<1x1x64xf32>
    %161 = vector.broadcast %160 : vector<1x1x64xf32> to vector<2x8x64xf32>
    %162 = arith.addf %159, %161 : vector<2x8x64xf32>
    %cst_61 = arith.constant dense<0.000000e+00> : vector<2x8xf32>
    %163 = vector.multi_reduction <add>, %162, %cst_61 [2] : vector<2x8x64xf32> to vector<2x8xf32>
    %164 = vector.shape_cast %163 : vector<2x8xf32> to vector<2x8x1xf32>
    %cst_62 = arith.constant dense<0.000000e+00> : vector<2x1xf32>
    %165 = vector.multi_reduction <add>, %164, %cst_62 [1] : vector<2x8x1xf32> to vector<2x1xf32>
    %166 = vector.shape_cast %165 : vector<2x1xf32> to vector<2x1x1xf32>
    %167 = arith.mulf %162, %162 : vector<2x8x64xf32>
    %cst_63 = arith.constant dense<0.000000e+00> : vector<2x8xf32>
    %168 = vector.multi_reduction <add>, %167, %cst_63 [2] : vector<2x8x64xf32> to vector<2x8xf32>
    %169 = vector.shape_cast %168 : vector<2x8xf32> to vector<2x8x1xf32>
    %cst_64 = arith.constant dense<0.000000e+00> : vector<2x1xf32>
    %170 = vector.multi_reduction <add>, %169, %cst_64 [1] : vector<2x8x1xf32> to vector<2x1xf32>
    %171 = vector.shape_cast %170 : vector<2x1xf32> to vector<2x1x1xf32>
    %cst_65 = arith.constant 0.001953125 : f32
    %172 = vector.broadcast %cst_65 : f32 to vector<2x1x1xf32>
    %173 = arith.mulf %166, %172 : vector<2x1x1xf32>
    %cst_66 = arith.constant 0.001953125 : f32
    %174 = vector.broadcast %cst_66 : f32 to vector<2x1x1xf32>
    %175 = arith.mulf %171, %174 : vector<2x1x1xf32>
    %176 = arith.mulf %173, %173 : vector<2x1x1xf32>
    %177 = arith.subf %175, %176 : vector<2x1x1xf32>
    %cst_67 = arith.constant 0.000000e+00 : f32
    %178 = vector.broadcast %cst_67 : f32 to vector<2x1x1xf32>
    %179 = arith.maximumf %177, %178 : vector<2x1x1xf32>
    %180 = vector.broadcast %173 : vector<2x1x1xf32> to vector<2x8x64xf32>
    %181 = arith.subf %162, %180 : vector<2x8x64xf32>
    %cst_68 = arith.constant 9.99999974E-6 : f32
    %182 = vector.broadcast %cst_68 : f32 to vector<2x1x1xf32>
    %183 = arith.addf %179, %182 : vector<2x1x1xf32>
    %184 = math.rsqrt %183 : vector<2x1x1xf32>
    %185 = vector.broadcast %184 : vector<2x1x1xf32> to vector<2x8x64xf32>
    %186 = arith.mulf %181, %185 : vector<2x8x64xf32>
    %cst_69 = arith.constant 0.000000e+00 : f32
    %187 = vector.broadcast %cst_69 : f32 to vector<2x8x64xf32>
    %188 = arith.maximumf %186, %187 : vector<2x8x64xf32>
    %189 = vector.shape_cast %188 : vector<2x8x64xf32> to vector<16x64xf32>
    %c0_70 = arith.constant 0 : index
    %c0_71 = arith.constant 0 : index
    %190 = vector.load %arg7[%c0_70, %c0_71] : memref<64x128xbf16, #tpu.memory_space<vmem>>, vector<64x128xbf16>
    %191 = arith.truncf %189 : vector<16x64xf32> to vector<16x64xbf16>
    %cst_72 = arith.constant dense<0.000000e+00> : vector<16x128xf32>
    %192 = tpu.matmul %191, %190, %cst_72 {dimension_numbers = #tpu.dot_dimension_numbers<[1], [0], [0], [1], [0, 0, 1, 1], [], []>} : vector<16x64xbf16>, vector<64x128xbf16>, vector<16x128xf32> -> vector<16x128xf32>
    %193 = vector.broadcast %6 : vector<1x128xf32> to vector<16x128xf32>
    %194 = arith.addf %192, %193 : vector<16x128xf32>
    %195 = vector.shape_cast %194 : vector<16x128xf32> to vector<2x8x128xf32>
    %cst_73 = arith.constant dense<0.000000e+00> : vector<2x8xf32>
    %196 = vector.multi_reduction <add>, %195, %cst_73 [2] : vector<2x8x128xf32> to vector<2x8xf32>
    %197 = vector.shape_cast %196 : vector<2x8xf32> to vector<2x8x1xf32>
    %cst_74 = arith.constant dense<0.000000e+00> : vector<2x1xf32>
    %198 = vector.multi_reduction <add>, %197, %cst_74 [1] : vector<2x8x1xf32> to vector<2x1xf32>
    %199 = vector.shape_cast %198 : vector<2x1xf32> to vector<2x1x1xf32>
    %200 = arith.mulf %195, %195 : vector<2x8x128xf32>
    %cst_75 = arith.constant dense<0.000000e+00> : vector<2x8xf32>
    %201 = vector.multi_reduction <add>, %200, %cst_75 [2] : vector<2x8x128xf32> to vector<2x8xf32>
    %202 = vector.shape_cast %201 : vector<2x8xf32> to vector<2x8x1xf32>
    %cst_76 = arith.constant dense<0.000000e+00> : vector<2x1xf32>
    %203 = vector.multi_reduction <add>, %202, %cst_76 [1] : vector<2x8x1xf32> to vector<2x1xf32>
    %204 = vector.shape_cast %203 : vector<2x1xf32> to vector<2x1x1xf32>
    %cst_77 = arith.constant 9.765625E-4 : f32
    %205 = vector.broadcast %cst_77 : f32 to vector<2x1x1xf32>
    %206 = arith.mulf %199, %205 : vector<2x1x1xf32>
    %cst_78 = arith.constant 9.765625E-4 : f32
    %207 = vector.broadcast %cst_78 : f32 to vector<2x1x1xf32>
    %208 = arith.mulf %204, %207 : vector<2x1x1xf32>
    %209 = arith.mulf %206, %206 : vector<2x1x1xf32>
    %210 = arith.subf %208, %209 : vector<2x1x1xf32>
    %cst_79 = arith.constant 0.000000e+00 : f32
    %211 = vector.broadcast %cst_79 : f32 to vector<2x1x1xf32>
    %212 = arith.maximumf %210, %211 : vector<2x1x1xf32>
    %213 = vector.broadcast %206 : vector<2x1x1xf32> to vector<2x8x128xf32>
    %214 = arith.subf %195, %213 : vector<2x8x128xf32>
    %cst_80 = arith.constant 9.99999974E-6 : f32
    %215 = vector.broadcast %cst_80 : f32 to vector<2x1x1xf32>
    %216 = arith.addf %212, %215 : vector<2x1x1xf32>
    %217 = math.rsqrt %216 : vector<2x1x1xf32>
    %218 = vector.broadcast %217 : vector<2x1x1xf32> to vector<2x8x128xf32>
    %219 = arith.mulf %214, %218 : vector<2x8x128xf32>
    %cst_81 = arith.constant 0.000000e+00 : f32
    %220 = vector.broadcast %cst_81 : f32 to vector<2x8x128xf32>
    %221 = arith.maximumf %219, %220 : vector<2x8x128xf32>
    %cst_82 = arith.constant dense<0xFF800000> : vector<2x128xf32>
    %222 = vector.multi_reduction <maximumf>, %221, %cst_82 [1] : vector<2x8x128xf32> to vector<2x128xf32>
    %c0_83 = arith.constant 0 : index
    %c0_84 = arith.constant 0 : index
    %c0_85 = arith.constant 0 : index
    %223 = vector.load %arg9[%c0_83, %c0_84, %c0_85] : memref<1x2x256xf32, #tpu.memory_space<vmem>>, vector<1x2x128xf32>
    %224 = vector.shape_cast %223 : vector<1x2x128xf32> to vector<2x128xf32>
    %225 = vector.shape_cast %222 : vector<2x128xf32> to vector<1x2x128xf32>
    tpu.vector_store %arg9[%c0_83, %c0_84, %c0_85], %225 {strides = array<i32>} : memref<1x2x256xf32, #tpu.memory_space<vmem>>, vector<1x2x128xf32>,
    %c0_86 = arith.constant 0 : index
    %c0_87 = arith.constant 0 : index
    %c128_88 = arith.constant 128 : index
    %226 = vector.load %arg9[%c0_86, %c0_87, %c128_88] : memref<1x2x256xf32, #tpu.memory_space<vmem>>, vector<1x2x128xf32>
    %227 = vector.shape_cast %226 : vector<1x2x128xf32> to vector<2x128xf32>
    %228 = vector.shape_cast %222 : vector<2x128xf32> to vector<1x2x128xf32>
    tpu.vector_store %arg9[%c0_86, %c0_87, %c128_88], %228 {strides = array<i32>} : memref<1x2x256xf32, #tpu.memory_space<vmem>>, vector<1x2x128xf32>,
    return
  }
  func.func @transform_0(%arg0: i32) -> (i32, i32, i32) {
    %c0_i32 = arith.constant 0 : i32
    %c0_i32_0 = arith.constant 0 : i32
    %c0_i32_1 = arith.constant 0 : i32
    return %arg0, %c0_i32, %c0_i32_0 : i32, i32, i32
  }
  func.func @transform_1(%arg0: i32) -> (i32, i32) {
    %c0_i32 = arith.constant 0 : i32
    %c0_i32_0 = arith.constant 0 : i32
    %c0_i32_1 = arith.constant 0 : i32
    return %c0_i32, %c0_i32_0 : i32, i32
  }
  func.func @transform_2(%arg0: i32) -> (i32, i32) {
    %c0_i32 = arith.constant 0 : i32
    %c0_i32_0 = arith.constant 0 : i32
    %c0_i32_1 = arith.constant 0 : i32
    return %c0_i32, %c0_i32_0 : i32, i32
  }
  func.func @transform_3(%arg0: i32) -> (i32, i32) {
    %c0_i32 = arith.constant 0 : i32
    %c0_i32_0 = arith.constant 0 : i32
    %c0_i32_1 = arith.constant 0 : i32
    return %c0_i32, %c0_i32_0 : i32, i32
  }
  func.func @transform_4(%arg0: i32) -> (i32, i32) {
    %c0_i32 = arith.constant 0 : i32
    %c0_i32_0 = arith.constant 0 : i32
    %c0_i32_1 = arith.constant 0 : i32
    return %c0_i32, %c0_i32_0 : i32, i32
  }
  func.func @transform_5(%arg0: i32) -> (i32, i32) {
    %c0_i32 = arith.constant 0 : i32
    %c0_i32_0 = arith.constant 0 : i32
    %c0_i32_1 = arith.constant 0 : i32
    return %c0_i32, %c0_i32_0 : i32, i32
  }
  func.func @transform_6(%arg0: i32) -> (i32, i32) {
    %c0_i32 = arith.constant 0 : i32
    %c0_i32_0 = arith.constant 0 : i32
    %c0_i32_1 = arith.constant 0 : i32
    return %c0_i32, %c0_i32_0 : i32, i32
  }
  func.func @transform_7(%arg0: i32) -> (i32, i32) {
    %c0_i32 = arith.constant 0 : i32
    %c0_i32_0 = arith.constant 0 : i32
    %c0_i32_1 = arith.constant 0 : i32
    return %c0_i32, %c0_i32_0 : i32, i32
  }
  func.func @transform_8(%arg0: i32) -> (i32, i32, i32) {
    %c0_i32 = arith.constant 0 : i32
    %c0_i32_0 = arith.constant 0 : i32
    %c0_i32_1 = arith.constant 0 : i32
    return %arg0, %c0_i32, %c0_i32_0 : i32, i32, i32
  }
}

</mosaic_0001>

<bundles_post_ra>
// kernel: tpu_custom_call.1
= control target key start
LH: loop header
LB: loop body
LE: loop exit
PB: predicated region body
PF: predicated region fallthrough
CT: control target
= control target key end

     0   :  { %s1656_s0 = inlined_call_operand.vmem [shape: f32[2,8,16], index: 0, kind: input, shape index: {}]   ;;  %s1657_s1 = inlined_call_operand.vmem [shape: bf16[16,64], index: 1, kind: input, shape index: {}]   ;;  %s1658_s2 = inlined_call_operand.vmem [shape: bf16[64,128], index: 2, kind: input, shape index: {}]   ;;  %s1659_s3 = inlined_call_operand.vmem [shape: bf16[256,64], index: 3, kind: input, shape index: {}]   ;;  %s1660_s4 = inlined_call_operand.vmem [shape: bf16[64,128], index: 4, kind: input, shape index: {}]   ;;  %s1661_s5 = inlined_call_operand.vmem [shape: bf16[256,64], index: 5, kind: input, shape index: {}]   ;;  %s1662_s6 = inlined_call_operand.vmem [shape: bf16[64,128], index: 6, kind: input, shape index: {}]   ;;  %s1663_s7 = inlined_call_operand.vmem [shape: f32[6,128], index: 7, kind: input, shape index: {}]   ;;  %s1664_s8 = inlined_call_operand.hbm [shape: f32[1,2,256], index: 8, kind: output, shape index: {}]  }
   0x1   :  { %v1266_v0 = vld [vmem:[%s1657_s1] sm:$0xff]  ;;  %v33_v2 = vld [vmem:[%s1656_s0 + $0x8] sm:$0xff] }
   0x2   :  { %v32_v1 = vld [vmem:[%s1656_s0] sm:$0xff] }
   0x3   :  { %v36_v3 = vpack.c.bf16 %v33_v2, %v32_v1 }
   0x4   :  { %13 = vsyncpa [#allocation3], 0  ;;  %55 = vmatpush.bf16.msra.mxu3 %v1266_v0  ;;  %vm44_vm0 = vcmask 130048   ;;  %v1421_v4 = vld [vmem:[%s1663_s7] sm:$0x3f]  ;;  %vm62_vm1 = vcmask 523264  }
   0x5   :  { %v37_v5 = vperm.slane %v1421_v4, 0  ;;  %v1270_v25 = vld [vmem:[%s1658_s2 + $0x18] sm:$0xff]  ;;  %v1269_v30 = vld [vmem:[%s1658_s2 + $0x10] sm:$0xff]  ;;  %v1268_v40 = vld [vmem:[%s1658_s2 + $0x8] sm:$0xff]  ;;  %vm375_vm14 = vcmask 1041409   ;;  %s1073_s22 = sshll.u32 %s1664_s8, 4  ;;  %s1074_s22 = int_to_ptr.hbm [resolvable:$true] %s1073_s22 }
   0x6   :  { %180 = vmatpush.bf16.msra.mxu1 %v1270_v25  ;;  %v1267_v47 = vld [vmem:[%s1658_s2] sm:$0xff]  ;;  %v1278_v25 = vld [vmem:[%s1659_s3 + $0x38] sm:$0xff] }
   0x7   :  { %1086 = vmatmul.msk.bf16.vlgmr.msra.gmra.mxu3 %vm44_vm0, %v36_v3  ;;  %339 = vmatpush.bf16.msra.mxu2 %v1278_v25 }
   0xa   :  { %181 = vmatpush.bf16.msra.mxu1 %v1269_v30 }
   0xe   :  { %182 = vmatpush.bf16.msra.mxu1 %v1268_v40 }
  0x12   :  { %183 = vmatpush.bf16.msra.mxu1 %v1267_v47 }
  0x8a   :  { %v57_v6 = vpop.f32.mrf.mxu3 }
  0x8b   :  { %v1424_v7 = vadd.f32 %v57_v6, %v37_v5 }
  0x8d   :  { %v63_v8 = vsel %vm62_vm1, %v1424_v7, 0.0  ;;  %v81_v9 = vmul.f32 %v1424_v7, %v1424_v7 }
  0x8e   :  { %64 = vadd.xlane.f32.xlu0 %v63_v8 }
  0x8f   :  { %v83_v10 = vsel %vm62_vm1, %v81_v9, 0.0 }
  0x90   :  { %84 = vadd.xlane.f32.xlu1 %v83_v10 }
  0x92   :  { %v59_v11 = vpop.f32.mrf.mxu3 }
  0x93   :  { %v1431_v12 = vadd.f32 %v59_v11, %v37_v5 }
  0x95   :  { %v66_v13 = vsel %vm62_vm1, %v1431_v12, 0.0  ;;  %v82_v14 = vmul.f32 %v1431_v12, %v1431_v12 }
  0x96   :  { %67 = vadd.xlane.f32.xlu0 %v66_v13 }
  0x97   :  { %v86_v15 = vsel %vm62_vm1, %v82_v14, 0.0 }
  0x98   :  { %87 = vadd.xlane.f32.xlu1 %v86_v15 }
 0x101   :  { %v65_v16 = vpop.xlane.xlu0 %64 }
 0x102   :  { %v69_v17 = vrot.slane %v65_v16, 4 }
 0x103   :  { %v85_v18 = vpop.xlane.xlu1 %84 }
 0x104   :  { %v70_v19 = vadd.f32 %v69_v17, %v65_v16  ;;  %v89_v20 = vrot.slane %v85_v18, 4 }
 0x106   :  { %v71_v21 = vrot.slane %v70_v19, 2  ;;  %v90_v22 = vadd.f32 %v89_v20, %v85_v18  ;;  %v148_v20 = vperm.slane %v1421_v4, 1 }
 0x108   :  { %v72_v23 = vadd.f32 %v71_v21, %v70_v19  ;;  %v91_v24 = vrot.slane %v90_v22, 2 }
 0x109   :  { %v68_v26 = vpop.xlane.xlu0 %67 }
 0x10a   :  { %v73_v27 = vrot.slane %v72_v23, 1  ;;  %v92_v28 = vadd.f32 %v91_v24, %v90_v22  ;;  %v75_v29 = vrot.slane %v68_v26, 4 }
 0x10b   :  { %v88_v31 = vpop.xlane.xlu1 %87 }
 0x10c   :  { %v74_v32 = vadd.f32 %v73_v27, %v72_v23  ;;  %v93_v33 = vrot.slane %v92_v28, 1  ;;  %v76_v34 = vadd.f32 %v75_v29, %v68_v26  ;;  %v95_v35 = vrot.slane %v88_v31, 4  ;;  %v1277_v26 = vld [vmem:[%s1659_s3 + $0x30] sm:$0xff]  ;;  %v1276_v27 = vld [vmem:[%s1659_s3 + $0x28] sm:$0xff] }
 0x10d   :  { %340 = vmatpush.bf16.msra.mxu2 %v1277_v26 }
 0x10e   :  { %v101_v36 = vmul.f32 0.001953125, %v74_v32  ;;  %v94_v37 = vadd.f32 %v93_v33, %v92_v28  ;;  %v77_v38 = vrot.slane %v76_v34, 2  ;;  %v96_v39 = vadd.f32 %v95_v35, %v88_v31  ;;  %v1275_v33 = vld [vmem:[%s1659_s3 + $0x20] sm:$0xff] }
 0x110   :  { %v105_v41 = vmul.f32 %v101_v36, %v101_v36  ;;  %v103_v42 = vmul.f32 0.001953125, %v94_v37  ;;  %v78_v43 = vadd.f32 %v77_v38, %v76_v34  ;;  %v97_v44 = vrot.slane %v96_v39, 2  ;;  %v1274_v38 = vld [vmem:[%s1659_s3 + $0x18] sm:$0xff] }
 0x111   :  { %v111_v10 = vsub.f32 %v1424_v7, %v101_v36  ;;  %341 = vmatpush.bf16.msra.mxu2 %v1276_v27 }
 0x112   :  { %v107_v45 = vsub.f32 %v103_v42, %v105_v41  ;;  %v79_v46 = vrot.slane %v78_v43, 1  ;;  %v98_v48 = vadd.f32 %v97_v44, %v96_v39  ;;  %v1286_v39 = vld [vmem:[%s1659_s3 + $0x78] sm:$0xff]  ;;  %v1273_v44 = vld [vmem:[%s1659_s3 + $0x10] sm:$0xff] }
 0x113   :  { %427 = vmatpush.bf16.msrb.mxu3 %v1286_v39 }
 0x114   :  { %v109_v49 = vmax.f32 %v107_v45, 0.0  ;;  %v80_v50 = vadd.f32 %v79_v46, %v78_v43  ;;  %v99_v51 = vrot.slane %v98_v48, 1  ;;  %v1285_v45 = vld [vmem:[%s1659_s3 + $0x70] sm:$0xff] }
 0x115   :  { %342 = vmatpush.bf16.msra.mxu2 %v1275_v33 }
 0x116   :  { %v113_v52 = vadd.f32 1e-05, %v109_v49  ;;  %v102_v53 = vmul.f32 0.001953125, %v80_v50  ;;  %v100_v54 = vadd.f32 %v99_v51, %v98_v48 }
 0x117   :  { %428 = vmatpush.bf16.msrb.mxu3 %v1285_v45 }
 0x118   :  { %1312 = vrsqrt.f32 %v113_v52  ;;  %v106_v55 = vmul.f32 %v102_v53, %v102_v53  ;;  %v104_v56 = vmul.f32 0.001953125, %v100_v54  ;;  %vm121_vm3 = vweird.f32 %v113_v52 }
 0x119   :  { %v112_v13 = vsub.f32 %v1431_v12, %v102_v53  ;;  %343 = vmatpush.bf16.msra.mxu2 %v1274_v38 }
 0x11a   :  { %v108_v57 = vsub.f32 %v104_v56, %v106_v55  ;;  %v1272_v55 = vld [vmem:[%s1659_s3 + $0x8] sm:$0xff] }
 0x11b   :  { %v1284_v56 = vld [vmem:[%s1659_s3 + $0x68] sm:$0xff] }
 0x11c   :  { %v110_v58 = vmax.f32 %v108_v57, 0.0  ;;  %429 = vmatpush.bf16.msrb.mxu3 %v1284_v56 }
 0x11d   :  { %344 = vmatpush.bf16.msra.mxu2 %v1273_v44 }
 0x11e   :  { %v1313_v59 = vpop.eup %1312  ;;  %v114_v61 = vadd.f32 1e-05, %v110_v58 }
 0x11f   :  { %v116_v60 = vmul.f32 %v1313_v59, %v113_v52  ;;  %vm122_vm2 = vweird.f32 %v1313_v59 }
 0x120   :  { %1314 = vrsqrt.f32 %v114_v61  ;;  %vm123_vm4 = vmor %vm121_vm3, %vm122_vm2  ;;  %vm131_vm6 = vweird.f32 %v114_v61 }
 0x121   :  { %v117_v62 = vmul.f32 %v1313_v59, %v116_v60  ;;  %345 = vmatpush.bf16.msra.mxu2 %v1272_v55 }
 0x123   :  { %v118_v63 = vmul.f32 0.5, %v117_v62 }
 0x125   :  { %v119_v0 = vsub.f32 1.5, %v118_v63  ;;  %v1271_v63 = vld [vmem:[%s1659_s3] sm:$0xff] }
 0x126   :  { %v1315_v1 = vpop.eup %1314  ;;  %346 = vmatpush.bf16.msra.mxu2 %v1271_v63 }
 0x127   :  { %v126_v2 = vmul.f32 %v1315_v1, %v114_v61  ;;  %v120_v3 = vmul.f32 %v1313_v59, %v119_v0  ;;  %vm132_vm5 = vweird.f32 %v1315_v1  ;;  %v1283_v0 = vld [vmem:[%s1659_s3 + $0x60] sm:$0xff] }
 0x128   :  { %vm133_vm7 = vmor %vm131_vm6, %vm132_vm5  ;;  %430 = vmatpush.bf16.msrb.mxu3 %v1283_v0 }
 0x129   :  { %v127_v5 = vmul.f32 %v1315_v1, %v126_v2  ;;  %v124_v8 = vsel %vm123_vm4, %v1313_v59, %v120_v3 }
 0x12a   :  { %v135_v14 = vmul.f32 %v124_v8, %v111_v10 }
 0x12b   :  { %v128_v6 = vmul.f32 0.5, %v127_v5 }
 0x12c   :  { %v137_v17 = vmax.f32 %v135_v14, 0.0 }
 0x12d   :  { %v129_v9 = vsub.f32 1.5, %v128_v6 }
 0x12f   :  { %v130_v11 = vmul.f32 %v1315_v1, %v129_v9 }
 0x131   :  { %v134_v15 = vsel %vm133_vm7, %v1315_v1, %v130_v11 }
 0x132   :  { %v136_v16 = vmul.f32 %v134_v15, %v112_v13  ;;  %v1282_v13 = vld [vmem:[%s1659_s3 + $0x58] sm:$0xff]  ;;  %v1281_v15 = vld [vmem:[%s1659_s3 + $0x50] sm:$0xff] }
 0x133   :  { %431 = vmatpush.bf16.msrb.mxu3 %v1282_v13 }
 0x134   :  { %v138_v18 = vmax.f32 %v136_v16, 0.0 }
 0x136   :  { %v147_v19 = vpack.c.bf16 %v138_v18, %v137_v17 }
 0x137   :  { %432 = vmatpush.bf16.msrb.mxu3 %v1281_v15 }
 0x138   :  { %1103 = vmatmul.msk.bf16.vlgmr.msra.gmra.mxu1 %vm62_vm1, %v147_v19 }
 0x1b5   :  { %v185_v21 = vpop.f32.mrf.mxu1 }
 0x1b6   :  { %v1454_v22 = vadd.f32 %v185_v21, %v148_v20 }
 0x1b8   :  { %190 = vadd.xlane.f32.xlu2 %v1454_v22  ;;  %v206_v7 = vmul.f32 %v1454_v22, %v1454_v22 }
 0x1ba   :  { %208 = vadd.xlane.f32.xlu0 %v206_v7 }
 0x1bd   :  { %v187_v12 = vpop.f32.mrf.mxu1 }
 0x1be   :  { %v1459_v23 = vadd.f32 %v187_v12, %v148_v20  ;;  %v1280_v20 = vld [vmem:[%s1659_s3 + $0x48] sm:$0xff]  ;;  %v1279_v12 = vld [vmem:[%s1659_s3 + $0x40] sm:$0xff] }
 0x1bf   :  { %433 = vmatpush.bf16.msrb.mxu3 %v1280_v20 }
 0x1c0   :  { %192 = vadd.xlane.f32.xlu2 %v1459_v23  ;;  %v207_v24 = vmul.f32 %v1459_v23, %v1459_v23 }
 0x1c2   :  { %210 = vadd.xlane.f32.xlu1 %v207_v24 }
 0x1c3   :  { %434 = vmatpush.bf16.msrb.mxu3 %v1279_v12 }
 0x22b   :  { %v191_v28 = vpop.xlane.xlu2 %190 }
 0x22c   :  { %v194_v29 = vrot.slane %v191_v28, 4 }
 0x22d   :  { %v209_v30 = vpop.xlane.xlu0 %208 }
 0x22e   :  { %v195_v31 = vadd.f32 %v194_v29, %v191_v28  ;;  %v212_v32 = vrot.slane %v209_v30, 4 }
 0x230   :  { %v196_v34 = vrot.slane %v195_v31, 2  ;;  %v213_v35 = vadd.f32 %v212_v32, %v209_v30 }
 0x232   :  { %v197_v36 = vadd.f32 %v196_v34, %v195_v31  ;;  %v214_v37 = vrot.slane %v213_v35, 2 }
 0x233   :  { %v193_v40 = vpop.xlane.xlu2 %192 }
 0x234   :  { %v198_v41 = vrot.slane %v197_v36, 1  ;;  %v215_v42 = vadd.f32 %v214_v37, %v213_v35  ;;  %v200_v43 = vrot.slane %v193_v40, 4 }
 0x235   :  { %v211_v46 = vpop.xlane.xlu1 %210 }
 0x236   :  { %v199_v47 = vadd.f32 %v198_v41, %v197_v36  ;;  %v216_v48 = vrot.slane %v215_v42, 1  ;;  %v201_v49 = vadd.f32 %v200_v43, %v193_v40  ;;  %v218_v50 = vrot.slane %v211_v46, 4 }
 0x238   :  { %v224_v51 = vmul.f32 0.0009765625, %v199_v47  ;;  %v217_v52 = vadd.f32 %v216_v48, %v215_v42  ;;  %v202_v53 = vrot.slane %v201_v49, 2  ;;  %v219_v54 = vadd.f32 %v218_v50, %v211_v46 }
 0x23a   :  { %v228_v57 = vmul.f32 %v224_v51, %v224_v51  ;;  %v226_v58 = vmul.f32 0.0009765625, %v217_v52  ;;  %v203_v59 = vadd.f32 %v202_v53, %v201_v49  ;;  %v220_v60 = vrot.slane %v219_v54, 2 }
 0x23b   :  { %v234_v27 = vsub.f32 %v1454_v22, %v224_v51 }
 0x23c   :  { %v230_v61 = vsub.f32 %v226_v58, %v228_v57  ;;  %v204_v62 = vrot.slane %v203_v59, 1  ;;  %v221_v1 = vadd.f32 %v220_v60, %v219_v54 }
 0x23e   :  { %v232_v2 = vmax.f32 %v230_v61, 0.0  ;;  %v205_v3 = vadd.f32 %v204_v62, %v203_v59  ;;  %v222_v5 = vrot.slane %v221_v1, 1  ;;  %v448_v61 = vperm.slane %v1421_v4, 2 }
 0x240   :  { %v236_v6 = vadd.f32 1e-05, %v232_v2  ;;  %v225_v8 = vmul.f32 0.0009765625, %v205_v3  ;;  %v223_v9 = vadd.f32 %v222_v5, %v221_v1 }
 0x242   :  { %1316 = vrsqrt.f32 %v236_v6  ;;  %v229_v10 = vmul.f32 %v225_v8, %v225_v8  ;;  %v227_v11 = vmul.f32 0.0009765625, %v223_v9  ;;  %vm244_vm9 = vweird.f32 %v236_v6 }
 0x243   :  { %v235_v38 = vsub.f32 %v1459_v23, %v225_v8 }
 0x244   :  { %v231_v14 = vsub.f32 %v227_v11, %v229_v10 }
 0x246   :  { %v233_v16 = vmax.f32 %v231_v14, 0.0 }
 0x248   :  { %v1317_v17 = vpop.eup %1316  ;;  %v237_v19 = vadd.f32 1e-05, %v233_v16 }
 0x249   :  { %v239_v18 = vmul.f32 %v1317_v17, %v236_v6  ;;  %vm245_vm8 = vweird.f32 %v1317_v17 }
 0x24a   :  { %1318 = vrsqrt.f32 %v237_v19  ;;  %vm246_vm10 = vmor %vm244_vm9, %vm245_vm8  ;;  %vm254_vm12 = vweird.f32 %v237_v19 }
 0x24b   :  { %v240_v21 = vmul.f32 %v1317_v17, %v239_v18 }
 0x24d   :  { %v241_v7 = vmul.f32 0.5, %v240_v21 }
 0x24f   :  { %v242_v24 = vsub.f32 1.5, %v241_v7 }
 0x250   :  { %v1319_v25 = vpop.eup %1318 }
 0x251   :  { %v243_v26 = vmul.f32 %v1317_v17, %v242_v24  ;;  %v249_v28 = vmul.f32 %v1319_v25, %v237_v19  ;;  %vm255_vm11 = vweird.f32 %v1319_v25  ;;  %v1290_v24 = vld [vmem:[%s1660_s4 + $0x18] sm:$0xff] }
 0x252   :  { %vm256_vm13 = vmor %vm254_vm12, %vm255_vm11  ;;  %568 = vmatpush.bf16.msra.mxu0 %v1290_v24  ;;  %v1297_v24 = vld [vmem:[%s1661_s5 + $0x30] sm:$0xff] }
 0x253   :  { %v247_v29 = vsel %vm246_vm10, %v1317_v17, %v243_v26  ;;  %v250_v30 = vmul.f32 %v1319_v25, %v249_v28  ;;  %v1289_v28 = vld [vmem:[%s1660_s4 + $0x10] sm:$0xff] }
 0x254   :  { %v258_v31 = vmul.f32 %v247_v29, %v234_v27 }
 0x255   :  { %v251_v32 = vmul.f32 0.5, %v250_v30 }
 0x256   :  { %v260_v33 = vmax.f32 %v258_v31, 0.0  ;;  %569 = vmatpush.bf16.msra.mxu0 %v1289_v28 }
 0x257   :  { %v252_v34 = vsub.f32 1.5, %v251_v32 }
 0x258   :  { %v262_v35 = vrot.slane %v260_v33, 4 }
 0x259   :  { %v253_v36 = vmul.f32 %v1319_v25, %v252_v34 }
 0x25a   :  { %v263_v37 = vmax.f32 %v260_v33, %v262_v35 }
 0x25b   :  { %v257_v39 = vsel %vm256_vm13, %v1319_v25, %v253_v36 }
 0x25c   :  { %v264_v40 = vrot.slane %v263_v37, 2  ;;  %v259_v41 = vmul.f32 %v257_v39, %v235_v38  ;;  %v1288_v38 = vld [vmem:[%s1660_s4 + $0x8] sm:$0xff] }
 0x25d   :  { %570 = vmatpush.bf16.msra.mxu0 %v1288_v38  ;;  %v1306_v38 = vld [vmem:[%s1661_s5 + $0x78] sm:$0xff] }
 0x25e   :  { %v261_v22 = vmax.f32 %v259_v41, 0.0  ;;  %v265_v42 = vmax.f32 %v263_v37, %v264_v40 }
 0x260   :  { %v268_v43 = vrot.slane %v261_v22, 4  ;;  %v290_v44 = vpack.c.bf16 %v261_v22, %v260_v33  ;;  %v266_v46 = vrot.slane %v265_v42, 1 }
 0x262   :  { %v269_v45 = vmax.f32 %v261_v22, %v268_v43  ;;  %347 = vmatmul.bf16.vlgmr.msra.gmra.mxu2 %v290_v44  ;;  %v267_v48 = vmax.f32 %v265_v42, %v266_v46  ;;  %v1287_v44 = vld [vmem:[%s1660_s4] sm:$0xff] }
 0x263   :  { %571 = vmatpush.bf16.msra.mxu0 %v1287_v44 }
 0x264   :  { %v270_v47 = vrot.slane %v269_v45, 2  ;;  %v369_v52 = vpack.c.bf16 %v267_v48, %v267_v48 }
 0x266   :  { %v271_v49 = vmax.f32 %v269_v45, %v270_v47  ;;  %v373_v23 = vunpack.c.l.b16 %v369_v52 }
 0x267   :  { %814 = vmatpush.bf16.msrb.mxu0 %v1306_v38 }
 0x268   :  { %v272_v50 = vrot.slane %v271_v49, 1 }
 0x26a   :  { %v273_v51 = vmax.f32 %v271_v49, %v272_v50 }
 0x26c   :  { %v370_v53 = vpack.c.bf16 %v273_v51, %v273_v51 }
 0x26e   :  { %v374_v54 = vunpack.c.l.b16 %v370_v53 }
 0x270   :  { %v376_v55 = vsel %vm375_vm14, %v374_v54, %v373_v23 }
 0x271   :  { %v377_v56 = vpack.c.b16 %v376_v55, %v376_v55 }
 0x273   :  { %435 = vmatmul.bf16.vlgmr.msrb.gmra.mxu3 %v377_v56 }
 0x2e5   :  { %v348_v57 = vpop.f32.mrf.mxu2 }
 0x2ed   :  { %v350_v0 = vpop.f32.mrf.mxu2 }
 0x2f6   :  { %v436_v58 = vpop.f32.mrf.mxu3 }
 0x2f7   :  { %v441_v59 = vrot.slane %v436_v58, 1  ;;  %v442_v60 = vperm.slane %v436_v58, 0 }
 0x2f9   :  { %v443_v62 = vperm.slane %v441_v59, 0  ;;  %v446_v63 = vadd.f32 %v442_v60, %v348_v57 }
 0x2fb   :  { %v447_v1 = vadd.f32 %v443_v62, %v350_v0  ;;  %v1516_v2 = vadd.f32 %v448_v61, %v446_v63 }
 0x2fd   :  { %v451_v3 = vsel %vm62_vm1, %v1516_v2, 0.0  ;;  %v469_v5 = vmul.f32 %v1516_v2, %v1516_v2  ;;  %v1522_v6 = vadd.f32 %v448_v61, %v447_v1 }
 0x2fe   :  { %452 = vadd.xlane.f32.xlu2 %v451_v3  ;;  %v438_v8 = vpop.f32.mrf.mxu3 }
 0x2ff   :  { %v471_v9 = vsel %vm62_vm1, %v469_v5, 0.0  ;;  %v454_v10 = vsel %vm62_vm1, %v1522_v6, 0.0  ;;  %v470_v11 = vmul.f32 %v1522_v6, %v1522_v6 }
 0x300   :  { %472 = vadd.xlane.f32.xlu1 %v471_v9  ;;  %455 = vadd.xlane.f32.xlu0 %v454_v10 }
 0x301   :  { %v474_v13 = vsel %vm62_vm1, %v470_v11, 0.0 }
 0x306   :  { %475 = vadd.xlane.f32.xlu2 %v474_v13 }
 0x371   :  { %v453_v14 = vpop.xlane.xlu2 %452 }
 0x372   :  { %v457_v15 = vrot.slane %v453_v14, 4 }
 0x373   :  { %v473_v16 = vpop.xlane.xlu1 %472  ;;  %v456_v17 = vpop.xlane.xlu0 %455 }
 0x374   :  { %v458_v18 = vadd.f32 %v457_v15, %v453_v14  ;;  %v477_v19 = vrot.slane %v473_v16, 4  ;;  %v463_v20 = vrot.slane %v456_v17, 4 }
 0x376   :  { %v459_v21 = vrot.slane %v458_v18, 2  ;;  %v478_v7 = vadd.f32 %v477_v19, %v473_v16  ;;  %v464_v12 = vadd.f32 %v463_v20, %v456_v17 }
 0x378   :  { %v460_v25 = vadd.f32 %v459_v21, %v458_v18  ;;  %v479_v26 = vrot.slane %v478_v7, 2  ;;  %v465_v27 = vrot.slane %v464_v12, 2  ;;  %v536_v18 = vperm.slane %v1421_v4, 3 }
 0x379   :  { %v476_v29 = vpop.xlane.xlu2 %475 }
 0x37a   :  { %v461_v30 = vrot.slane %v460_v25, 1  ;;  %v480_v31 = vadd.f32 %v479_v26, %v478_v7  ;;  %v466_v32 = vadd.f32 %v465_v27, %v464_v12  ;;  %v483_v33 = vrot.slane %v476_v29, 4  ;;  %v1298_v12 = vld [vmem:[%s1661_s5 + $0x38] sm:$0xff] }
 0x37b   :  { %727 = vmatpush.bf16.msrb.mxu1 %v1298_v12 }
 0x37c   :  { %v462_v34 = vadd.f32 %v461_v30, %v460_v25  ;;  %v481_v35 = vrot.slane %v480_v31, 1  ;;  %v467_v36 = vrot.slane %v466_v32, 1  ;;  %v484_v37 = vadd.f32 %v483_v33, %v476_v29  ;;  %v1296_v25 = vld [vmem:[%s1661_s5 + $0x28] sm:$0xff] }
 0x37e   :  { %v489_v39 = vmul.f32 0.001953125, %v462_v34  ;;  %v482_v40 = vadd.f32 %v481_v35, %v480_v31  ;;  %v485_v41 = vrot.slane %v484_v37, 2  ;;  %v468_v22 = vadd.f32 %v467_v36, %v466_v32  ;;  %v1295_v31 = vld [vmem:[%s1661_s5 + $0x20] sm:$0xff]  ;;  %v1294_v36 = vld [vmem:[%s1661_s5 + $0x18] sm:$0xff] }
 0x37f   :  { %728 = vmatpush.bf16.msrb.mxu1 %v1297_v24 }
 0x380   :  { %v493_v42 = vmul.f32 %v489_v39, %v489_v39  ;;  %v491_v43 = vmul.f32 0.001953125, %v482_v40  ;;  %v486_v45 = vadd.f32 %v485_v41, %v484_v37  ;;  %v490_v47 = vmul.f32 0.001953125, %v468_v22 }
 0x381   :  { %v499_v8 = vsub.f32 %v1516_v2, %v489_v39 }
 0x382   :  { %v495_v46 = vsub.f32 %v491_v43, %v493_v42  ;;  %v487_v48 = vrot.slane %v486_v45, 1  ;;  %v494_v52 = vmul.f32 %v490_v47, %v490_v47  ;;  %v500_v10 = vsub.f32 %v1522_v6, %v490_v47  ;;  %v1305_v47 = vld [vmem:[%s1661_s5 + $0x70] sm:$0xff] }
 0x383   :  { %729 = vmatpush.bf16.msrb.mxu1 %v1296_v25  ;;  %815 = vmatpush.bf16.msrb.mxu0 %v1305_v47 }
 0x384   :  { %v497_v49 = vmax.f32 %v495_v46, 0.0  ;;  %v488_v50 = vadd.f32 %v487_v48, %v486_v45  ;;  %v1293_v46 = vld [vmem:[%s1661_s5 + $0x10] sm:$0xff] }
 0x386   :  { %v501_v51 = vadd.f32 1e-05, %v497_v49  ;;  %v492_v53 = vmul.f32 0.001953125, %v488_v50 }
 0x387   :  { %730 = vmatpush.bf16.msrb.mxu1 %v1295_v31 }
 0x388   :  { %1320 = vrsqrt.f32 %v501_v51  ;;  %v496_v23 = vsub.f32 %v492_v53, %v494_v52  ;;  %vm509_vm0 = vweird.f32 %v501_v51  ;;  %v1292_v52 = vld [vmem:[%s1661_s5 + $0x8] sm:$0xff] }
 0x389   :  { %v1304_v53 = vld [vmem:[%s1661_s5 + $0x68] sm:$0xff] }
 0x38a   :  { %v498_v54 = vmax.f32 %v496_v23, 0.0  ;;  %816 = vmatpush.bf16.msrb.mxu0 %v1304_v53 }
 0x38b   :  { %731 = vmatpush.bf16.msrb.mxu1 %v1294_v36 }
 0x38c   :  { %v502_v55 = vadd.f32 1e-05, %v498_v54 }
 0x38e   :  { %v1321_v56 = vpop.eup %1320  ;;  %1322 = vrsqrt.f32 %v502_v55  ;;  %vm519_vm4 = vweird.f32 %v502_v55 }
 0x38f   :  { %v504_v57 = vmul.f32 %v1321_v56, %v501_v51  ;;  %vm510_vm15 = vweird.f32 %v1321_v56  ;;  %732 = vmatpush.bf16.msrb.mxu1 %v1293_v46 }
 0x390   :  { %vm511_vm2 = vmor %vm509_vm0, %vm510_vm15 }
 0x391   :  { %v505_v58 = vmul.f32 %v1321_v56, %v504_v57 }
 0x393   :  { %v506_v59 = vmul.f32 0.5, %v505_v58  ;;  %733 = vmatpush.bf16.msrb.mxu1 %v1292_v52 }
 0x394   :  { %v1323_v60 = vpop.eup %1322 }
 0x395   :  { %v507_v61 = vsub.f32 1.5, %v506_v59  ;;  %v514_v62 = vmul.f32 %v1323_v60, %v502_v55  ;;  %vm520_vm3 = vweird.f32 %v1323_v60  ;;  %v1291_v59 = vld [vmem:[%s1661_s5] sm:$0xff] }
 0x396   :  { %vm521_vm5 = vmor %vm519_vm4, %vm520_vm3 }
 0x397   :  { %v508_v63 = vmul.f32 %v1321_v56, %v507_v61  ;;  %v515_v0 = vmul.f32 %v1323_v60, %v514_v62  ;;  %v1303_v61 = vld [vmem:[%s1661_s5 + $0x60] sm:$0xff]  ;;  %734 = vmatpush.bf16.msrb.mxu1 %v1291_v59 }
 0x398   :  { %817 = vmatpush.bf16.msrb.mxu0 %v1303_v61 }
 0x399   :  { %v516_v1 = vmul.f32 0.5, %v515_v0  ;;  %v512_v3 = vsel %vm511_vm2, %v1321_v56, %v508_v63 }
 0x39a   :  { %v523_v11 = vmul.f32 %v512_v3, %v499_v8 }
 0x39b   :  { %v517_v5 = vsub.f32 1.5, %v516_v1 }
 0x39c   :  { %v525_v15 = vmax.f32 %v523_v11, 0.0 }
 0x39d   :  { %v518_v9 = vmul.f32 %v1323_v60, %v517_v5 }
 0x39f   :  { %v522_v13 = vsel %vm521_vm5, %v1323_v60, %v518_v9 }
 0x3a0   :  { %v524_v14 = vmul.f32 %v522_v13, %v500_v10  ;;  %v1302_v10 = vld [vmem:[%s1661_s5 + $0x58] sm:$0xff]  ;;  %v1301_v13 = vld [vmem:[%s1661_s5 + $0x50] sm:$0xff] }
 0x3a1   :  { %818 = vmatpush.bf16.msrb.mxu0 %v1302_v10 }
 0x3a2   :  { %v526_v16 = vmax.f32 %v524_v14, 0.0 }
 0x3a4   :  { %v535_v17 = vpack.c.bf16 %v526_v16, %v525_v15 }
 0x3a5   :  { %819 = vmatpush.bf16.msrb.mxu0 %v1301_v13 }
 0x3a6   :  { %1184 = vmatmul.msk.bf16.vlgmr.msra.gmra.mxu0 %vm62_vm1, %v535_v17 }
 0x423   :  { %v573_v19 = vpop.f32.mrf.mxu0 }
 0x424   :  { %v1546_v20 = vadd.f32 %v573_v19, %v536_v18 }
 0x426   :  { %578 = vadd.xlane.f32.xlu0 %v1546_v20  ;;  %v594_v2 = vmul.f32 %v1546_v20, %v1546_v20 }
 0x428   :  { %596 = vadd.xlane.f32.xlu2 %v594_v2 }
 0x42b   :  { %v575_v6 = vpop.f32.mrf.mxu0 }
 0x42c   :  { %v1551_v21 = vadd.f32 %v575_v6, %v536_v18  ;;  %v1300_v18 = vld [vmem:[%s1661_s5 + $0x48] sm:$0xff]  ;;  %v1299_v6 = vld [vmem:[%s1661_s5 + $0x40] sm:$0xff] }
 0x42d   :  { %820 = vmatpush.bf16.msrb.mxu0 %v1300_v18 }
 0x42e   :  { %580 = vadd.xlane.f32.xlu1 %v1551_v21  ;;  %v595_v7 = vmul.f32 %v1551_v21, %v1551_v21 }
 0x430   :  { %598 = vadd.xlane.f32.xlu0 %v595_v7 }
 0x431   :  { %821 = vmatpush.bf16.msrb.mxu0 %v1299_v6  ;;  %v1310_v6 = vld [vmem:[%s1662_s6 + $0x18] sm:$0xff] }
 0x432   :  { %955 = vmatpush.bf16.msrb.mxu2 %v1310_v6 }
 0x499   :  { %v579_v26 = vpop.xlane.xlu0 %578 }
 0x49a   :  { %v582_v27 = vrot.slane %v579_v26, 4 }
 0x49b   :  { %v597_v28 = vpop.xlane.xlu2 %596 }
 0x49c   :  { %v583_v29 = vadd.f32 %v582_v27, %v579_v26  ;;  %v600_v30 = vrot.slane %v597_v28, 4 }
 0x49e   :  { %v584_v32 = vrot.slane %v583_v29, 2  ;;  %v601_v33 = vadd.f32 %v600_v30, %v597_v28 }
 0x4a0   :  { %v585_v34 = vadd.f32 %v584_v32, %v583_v29  ;;  %v602_v35 = vrot.slane %v601_v33, 2 }
 0x4a1   :  { %v581_v37 = vpop.xlane.xlu1 %580 }
 0x4a2   :  { %v586_v39 = vrot.slane %v585_v34, 1  ;;  %v603_v40 = vadd.f32 %v602_v35, %v601_v33  ;;  %v588_v41 = vrot.slane %v581_v37, 4 }
 0x4a3   :  { %v599_v22 = vpop.xlane.xlu0 %598 }
 0x4a4   :  { %v587_v42 = vadd.f32 %v586_v39, %v585_v34  ;;  %v604_v43 = vrot.slane %v603_v40, 1  ;;  %v589_v44 = vadd.f32 %v588_v41, %v581_v37  ;;  %v606_v45 = vrot.slane %v599_v22, 4 }
 0x4a6   :  { %v612_v48 = vmul.f32 0.0009765625, %v587_v42  ;;  %v605_v49 = vadd.f32 %v604_v43, %v603_v40  ;;  %v590_v50 = vrot.slane %v589_v44, 2  ;;  %v607_v51 = vadd.f32 %v606_v45, %v599_v22 }
 0x4a8   :  { %v616_v23 = vmul.f32 %v612_v48, %v612_v48  ;;  %v614_v54 = vmul.f32 0.0009765625, %v605_v49  ;;  %v591_v55 = vadd.f32 %v590_v50, %v589_v44  ;;  %v608_v56 = vrot.slane %v607_v51, 2 }
 0x4a9   :  { %v622_v25 = vsub.f32 %v1546_v20, %v612_v48 }
 0x4aa   :  { %v618_v57 = vsub.f32 %v614_v54, %v616_v23  ;;  %v592_v58 = vrot.slane %v591_v55, 1  ;;  %v609_v60 = vadd.f32 %v608_v56, %v607_v51 }
 0x4ac   :  { %v620_v62 = vmax.f32 %v618_v57, 0.0  ;;  %v593_v63 = vadd.f32 %v592_v58, %v591_v55  ;;  %v610_v0 = vrot.slane %v609_v60, 1  ;;  %v835_v57 = vperm.slane %v1421_v4, 4 }
 0x4ae   :  { %v624_v1 = vadd.f32 1e-05, %v620_v62  ;;  %v613_v3 = vmul.f32 0.0009765625, %v593_v63  ;;  %v611_v5 = vadd.f32 %v610_v0, %v609_v60 }
 0x4b0   :  { %1324 = vrsqrt.f32 %v624_v1  ;;  %v617_v8 = vmul.f32 %v613_v3, %v613_v3  ;;  %v615_v9 = vmul.f32 0.0009765625, %v611_v5  ;;  %vm632_vm7 = vweird.f32 %v624_v1 }
 0x4b1   :  { %v623_v36 = vsub.f32 %v1551_v21, %v613_v3 }
 0x4b2   :  { %v619_v11 = vsub.f32 %v615_v9, %v617_v8 }
 0x4b4   :  { %v621_v14 = vmax.f32 %v619_v11, 0.0 }
 0x4b6   :  { %v1325_v15 = vpop.eup %1324  ;;  %v625_v17 = vadd.f32 1e-05, %v621_v14 }
 0x4b7   :  { %v627_v16 = vmul.f32 %v1325_v15, %v624_v1  ;;  %vm633_vm6 = vweird.f32 %v1325_v15 }
 0x4b8   :  { %1326 = vrsqrt.f32 %v625_v17  ;;  %vm634_vm8 = vmor %vm632_vm7, %vm633_vm6  ;;  %vm642_vm10 = vweird.f32 %v625_v17 }
 0x4b9   :  { %v628_v19 = vmul.f32 %v1325_v15, %v627_v16 }
 0x4bb   :  { %v629_v2 = vmul.f32 0.5, %v628_v19 }
 0x4bd   :  { %v630_v7 = vsub.f32 1.5, %v629_v2 }
 0x4be   :  { %v1327_v12 = vpop.eup %1326 }
 0x4bf   :  { %v631_v24 = vmul.f32 %v1325_v15, %v630_v7  ;;  %v637_v26 = vmul.f32 %v1327_v12, %v625_v17  ;;  %vm643_vm9 = vweird.f32 %v1327_v12 }
 0x4c0   :  { %vm644_vm11 = vmor %vm642_vm10, %vm643_vm9  ;;  %vm1057_vm9 = vcmask 1043459   ;;  %vm1059_vm10 = vcmask 1045509  }
 0x4c1   :  { %v635_v27 = vsel %vm634_vm8, %v1325_v15, %v631_v24  ;;  %v638_v28 = vmul.f32 %v1327_v12, %v637_v26 }
 0x4c2   :  { %v646_v29 = vmul.f32 %v635_v27, %v622_v25 }
 0x4c3   :  { %v639_v30 = vmul.f32 0.5, %v638_v28 }
 0x4c4   :  { %v648_v31 = vmax.f32 %v646_v29, 0.0 }
 0x4c5   :  { %v640_v32 = vsub.f32 1.5, %v639_v30  ;;  %v1309_v30 = vld [vmem:[%s1662_s6 + $0x10] sm:$0xff] }
 0x4c6   :  { %v650_v33 = vrot.slane %v648_v31, 4  ;;  %956 = vmatpush.bf16.msrb.mxu2 %v1309_v30 }
 0x4c7   :  { %v641_v34 = vmul.f32 %v1327_v12, %v640_v32 }
 0x4c8   :  { %v651_v35 = vmax.f32 %v648_v31, %v650_v33 }
 0x4c9   :  { %v645_v37 = vsel %vm644_vm11, %v1327_v12, %v641_v34  ;;  %vm1061_vm11 = vcmask 1047559  }
 0x4ca   :  { %v652_v38 = vrot.slane %v651_v35, 2  ;;  %v647_v39 = vmul.f32 %v645_v37, %v623_v36 }
 0x4cc   :  { %v649_v20 = vmax.f32 %v647_v39, 0.0  ;;  %v653_v40 = vmax.f32 %v651_v35, %v652_v38  ;;  %v1308_v35 = vld [vmem:[%s1662_s6 + $0x8] sm:$0xff] }
 0x4cd   :  { %957 = vmatpush.bf16.msrb.mxu2 %v1308_v35 }
 0x4ce   :  { %v656_v41 = vrot.slane %v649_v20, 4  ;;  %v678_v22 = vpack.c.bf16 %v649_v20, %v648_v31  ;;  %v654_v43 = vrot.slane %v653_v40, 1 }
 0x4d0   :  { %v657_v42 = vmax.f32 %v649_v20, %v656_v41  ;;  %735 = vmatmul.bf16.vlgmr.msrb.gmra.mxu1 %v678_v22  ;;  %v655_v45 = vmax.f32 %v653_v40, %v654_v43  ;;  %v1307_v41 = vld [vmem:[%s1662_s6] sm:$0xff] }
 0x4d1   :  { %958 = vmatpush.bf16.msrb.mxu2 %v1307_v41 }
 0x4d2   :  { %v658_v44 = vrot.slane %v657_v42, 2  ;;  %v757_v49 = vpack.c.bf16 %v655_v45, %v655_v45 }
 0x4d4   :  { %v659_v46 = vmax.f32 %v657_v42, %v658_v44  ;;  %v761_v51 = vunpack.c.l.b16 %v757_v49 }
 0x4d6   :  { %v660_v47 = vrot.slane %v659_v46, 1 }
 0x4d8   :  { %v661_v48 = vmax.f32 %v659_v46, %v660_v47 }
 0x4da   :  { %v758_v50 = vpack.c.bf16 %v661_v48, %v661_v48 }
 0x4dc   :  { %v762_v21 = vunpack.c.l.b16 %v758_v50 }
 0x4de   :  { %v763_v52 = vsel %vm375_vm14, %v762_v21, %v761_v51 }
 0x4df   :  { %v764_v53 = vpack.c.b16 %v763_v52, %v763_v52 }
 0x4e1   :  { %822 = vmatmul.bf16.vlgmr.msrb.gmra.mxu0 %v764_v53 }
 0x54d   :  { %v736_v23 = vpop.f32.mrf.mxu1 }
 0x555   :  { %v738_v60 = vpop.f32.mrf.mxu1 }
 0x55e   :  { %v823_v54 = vpop.f32.mrf.mxu0 }
 0x55f   :  { %v828_v55 = vrot.slane %v823_v54, 1  ;;  %v829_v56 = vperm.slane %v823_v54, 0 }
 0x561   :  { %v830_v58 = vperm.slane %v828_v55, 0  ;;  %v833_v59 = vadd.f32 %v829_v56, %v736_v23 }
 0x563   :  { %v834_v61 = vadd.f32 %v830_v58, %v738_v60  ;;  %v1608_v62 = vadd.f32 %v835_v57, %v833_v59 }
 0x565   :  { %v838_v63 = vsel %vm62_vm1, %v1608_v62, 0.0  ;;  %v856_v0 = vmul.f32 %v1608_v62, %v1608_v62  ;;  %v1614_v1 = vadd.f32 %v835_v57, %v834_v61 }
 0x566   :  { %839 = vadd.xlane.f32.xlu1 %v838_v63  ;;  %v825_v3 = vpop.f32.mrf.mxu0 }
 0x567   :  { %v858_v5 = vsel %vm62_vm1, %v856_v0, 0.0  ;;  %v841_v4 = vsel %vm62_vm1, %v1614_v1, 0.0  ;;  %v857_v8 = vmul.f32 %v1614_v1, %v1614_v1 }
 0x568   :  { %859 = vadd.xlane.f32.xlu0 %v858_v5  ;;  %842 = vadd.xlane.f32.xlu2 %v841_v4 }
 0x569   :  { %v861_v9 = vsel %vm62_vm1, %v857_v8, 0.0 }
 0x56e   :  { %862 = vadd.xlane.f32.xlu1 %v861_v9 }
 0x5d9   :  { %v840_v10 = vpop.xlane.xlu1 %839 }
 0x5da   :  { %v844_v11 = vrot.slane %v840_v10, 4 }
 0x5db   :  { %v860_v13 = vpop.xlane.xlu0 %859  ;;  %v843_v14 = vpop.xlane.xlu2 %842 }
 0x5dc   :  { %v845_v15 = vadd.f32 %v844_v11, %v840_v10  ;;  %v864_v16 = vrot.slane %v860_v13, 4  ;;  %v850_v17 = vrot.slane %v843_v14, 4 }
 0x5de   :  { %v846_v18 = vrot.slane %v845_v15, 2  ;;  %v865_v19 = vadd.f32 %v864_v16, %v860_v13  ;;  %v851_v2 = vadd.f32 %v850_v17, %v843_v14  ;;  %v1336_v14 = vld [vmem:[%s1663_s7] sm:$0x3f]  ;;  %s1363_s7 = smov [#allocation2]  }
 0x5df   :  { %s1071_s19 = sshll.u32 %s1363_s7, 4  ;;  %s1072_s19 = int_to_ptr.vmem [resolvable:$true] %s1071_s19 }
 0x5e0   :  { %v847_v7 = vadd.f32 %v846_v18, %v845_v15  ;;  %v866_v12 = vrot.slane %v865_v19, 2  ;;  %v852_v24 = vrot.slane %v851_v2, 2  ;;  %v923_v15 = vperm.slane %v1336_v14, 5 }
 0x5e1   :  { %v863_v25 = vpop.xlane.xlu1 %862 }
 0x5e2   :  { %v848_v26 = vrot.slane %v847_v7, 1  ;;  %v867_v27 = vadd.f32 %v866_v12, %v865_v19  ;;  %v853_v28 = vadd.f32 %v852_v24, %v851_v2  ;;  %v870_v29 = vrot.slane %v863_v25, 4 }
 0x5e4   :  { %v849_v31 = vadd.f32 %v848_v26, %v847_v7  ;;  %v868_v32 = vrot.slane %v867_v27, 1  ;;  %v854_v33 = vrot.slane %v853_v28, 1  ;;  %v871_v34 = vadd.f32 %v870_v29, %v863_v25 }
 0x5e6   :  { %v876_v36 = vmul.f32 0.001953125, %v849_v31  ;;  %v869_v37 = vadd.f32 %v868_v32, %v867_v27  ;;  %v872_v38 = vrot.slane %v871_v34, 2  ;;  %v855_v39 = vadd.f32 %v854_v33, %v853_v28 }
 0x5e8   :  { %v880_v20 = vmul.f32 %v876_v36, %v876_v36  ;;  %v878_v40 = vmul.f32 0.001953125, %v869_v37  ;;  %v873_v22 = vadd.f32 %v872_v38, %v871_v34  ;;  %v877_v43 = vmul.f32 0.001953125, %v855_v39 }
 0x5e9   :  { %v886_v0 = vsub.f32 %v1608_v62, %v876_v36 }
 0x5ea   :  { %v882_v42 = vsub.f32 %v878_v40, %v880_v20  ;;  %v874_v44 = vrot.slane %v873_v22, 1  ;;  %v881_v48 = vmul.f32 %v877_v43, %v877_v43  ;;  %v887_v5 = vsub.f32 %v1614_v1, %v877_v43 }
 0x5ec   :  { %v884_v45 = vmax.f32 %v882_v42, 0.0  ;;  %v875_v46 = vadd.f32 %v874_v44, %v873_v22 }
 0x5ee   :  { %v888_v47 = vadd.f32 1e-05, %v884_v45  ;;  %v879_v49 = vmul.f32 0.001953125, %v875_v46 }
 0x5f0   :  { %1328 = vrsqrt.f32 %v888_v47  ;;  %v883_v50 = vsub.f32 %v879_v49, %v881_v48  ;;  %vm896_vm13 = vweird.f32 %v888_v47 }
 0x5f2   :  { %v885_v51 = vmax.f32 %v883_v50, 0.0 }
 0x5f4   :  { %v889_v21 = vadd.f32 1e-05, %v885_v51 }
 0x5f6   :  { %v1329_v52 = vpop.eup %1328  ;;  %1330 = vrsqrt.f32 %v889_v21  ;;  %vm906_vm2 = vweird.f32 %v889_v21 }
 0x5f7   :  { %v891_v53 = vmul.f32 %v1329_v52, %v888_v47  ;;  %vm897_vm12 = vweird.f32 %v1329_v52 }
 0x5f8   :  { %vm898_vm15 = vmor %vm896_vm13, %vm897_vm12 }
 0x5f9   :  { %v892_v23 = vmul.f32 %v1329_v52, %v891_v53 }
 0x5fb   :  { %v893_v54 = vmul.f32 0.5, %v892_v23 }
 0x5fc   :  { %v1331_v55 = vpop.eup %1330 }
 0x5fd   :  { %v894_v56 = vsub.f32 1.5, %v893_v54  ;;  %v901_v57 = vmul.f32 %v1331_v55, %v889_v21  ;;  %vm907_vm0 = vweird.f32 %v1331_v55 }
 0x5fe   :  { %vm908_vm3 = vmor %vm906_vm2, %vm907_vm0 }
 0x5ff   :  { %v902_v58 = vmul.f32 %v1331_v55, %v901_v57  ;;  %v895_v59 = vmul.f32 %v1329_v52, %v894_v56 }
 0x601   :  { %v903_v60 = vmul.f32 0.5, %v902_v58  ;;  %v899_v63 = vsel %vm898_vm15, %v1329_v52, %v895_v59 }
 0x602   :  { %v910_v4 = vmul.f32 %v899_v63, %v886_v0 }
 0x603   :  { %v904_v61 = vsub.f32 1.5, %v903_v60 }
 0x604   :  { %v912_v10 = vmax.f32 %v910_v4, 0.0 }
 0x605   :  { %v905_v3 = vmul.f32 %v1331_v55, %v904_v61 }
 0x607   :  { %v909_v8 = vsel %vm908_vm3, %v1331_v55, %v905_v3 }
 0x608   :  { %v911_v9 = vmul.f32 %v909_v8, %v887_v5 }
 0x60a   :  { %v913_v11 = vmax.f32 %v911_v9, 0.0 }
 0x60c   :  { %v922_v13 = vpack.c.bf16 %v913_v11, %v912_v10 }
 0x60e   :  { %1265 = vmatmul.msk.bf16.vlgmr.msrb.gmra.mxu2 %vm62_vm1, %v922_v13 }
 0x691   :  { %v960_v16 = vpop.f32.mrf.mxu2 }
 0x692   :  { %v1640_v62 = vadd.f32 %v960_v16, %v923_v15 }
 0x694   :  { %965 = vadd.xlane.f32.xlu0 %v1640_v62  ;;  %v981_v19 = vmul.f32 %v1640_v62, %v1640_v62 }
 0x699   :  { %v962_v1 = vpop.f32.mrf.mxu2 }
 0x69a   :  { %v1643_v17 = vadd.f32 %v962_v1, %v923_v15 }
 0x69c   :  { %967 = vadd.xlane.f32.xlu2 %v1643_v17  ;;  %v982_v18 = vmul.f32 %v1643_v17, %v1643_v17 }
 0x69e   :  { %985 = vadd.xlane.f32.xlu1 %v982_v18 }
 0x6a4   :  { %983 = vadd.xlane.f32.xlu2 %v981_v19 }
 0x707   :  { %v966_v2 = vpop.xlane.xlu0 %965 }
 0x708   :  { %v969_v6 = vrot.slane %v966_v2, 4 }
 0x70a   :  { %v970_v7 = vadd.f32 %v969_v6, %v966_v2 }
 0x70c   :  { %v971_v24 = vrot.slane %v970_v7, 2 }
 0x70e   :  { %v972_v29 = vadd.f32 %v971_v24, %v970_v7 }
 0x70f   :  { %v968_v12 = vpop.xlane.xlu2 %967 }
 0x710   :  { %v975_v25 = vrot.slane %v968_v12, 4  ;;  %v973_v35 = vrot.slane %v972_v29, 1 }
 0x711   :  { %v986_v26 = vpop.xlane.xlu1 %985 }
 0x712   :  { %v976_v27 = vadd.f32 %v975_v25, %v968_v12  ;;  %v993_v28 = vrot.slane %v986_v26, 4  ;;  %v974_v41 = vadd.f32 %v973_v35, %v972_v29 }
 0x714   :  { %v977_v30 = vrot.slane %v976_v27, 2  ;;  %v994_v31 = vadd.f32 %v993_v28, %v986_v26  ;;  %v999_v47 = vmul.f32 0.0009765625, %v974_v41 }
 0x716   :  { %v978_v32 = vadd.f32 %v977_v30, %v976_v27  ;;  %v995_v33 = vrot.slane %v994_v31, 2  ;;  %v1003_v21 = vmul.f32 %v999_v47, %v999_v47  ;;  %v1009_v14 = vsub.f32 %v1640_v62, %v999_v47 }
 0x717   :  { %v984_v34 = vpop.xlane.xlu2 %983 }
 0x718   :  { %v979_v36 = vrot.slane %v978_v32, 1  ;;  %v996_v37 = vadd.f32 %v995_v33, %v994_v31  ;;  %v987_v38 = vrot.slane %v984_v34, 4 }
 0x71a   :  { %v980_v39 = vadd.f32 %v979_v36, %v978_v32  ;;  %v997_v20 = vrot.slane %v996_v37, 1  ;;  %v988_v40 = vadd.f32 %v987_v38, %v984_v34 }
 0x71c   :  { %v1000_v22 = vmul.f32 0.0009765625, %v980_v39  ;;  %v998_v42 = vadd.f32 %v997_v20, %v996_v37  ;;  %v989_v43 = vrot.slane %v988_v40, 2 }
 0x71e   :  { %v1004_v44 = vmul.f32 %v1000_v22, %v1000_v22  ;;  %v1002_v45 = vmul.f32 0.0009765625, %v998_v42  ;;  %v990_v46 = vadd.f32 %v989_v43, %v988_v40  ;;  %v1010_v5 = vsub.f32 %v1643_v17, %v1000_v22 }
 0x720   :  { %v1006_v48 = vsub.f32 %v1002_v45, %v1004_v44  ;;  %v991_v49 = vrot.slane %v990_v46, 1 }
 0x722   :  { %v1008_v50 = vmax.f32 %v1006_v48, 0.0  ;;  %v992_v51 = vadd.f32 %v991_v49, %v990_v46 }
 0x724   :  { %v1012_v52 = vadd.f32 1e-05, %v1008_v50  ;;  %v1001_v53 = vmul.f32 0.0009765625, %v992_v51 }
 0x726   :  { %1332 = vrsqrt.f32 %v1012_v52  ;;  %v1005_v23 = vsub.f32 %v1001_v53, %v1003_v21  ;;  %vm1029_vm4 = vweird.f32 %v1012_v52 }
 0x728   :  { %v1007_v54 = vmax.f32 %v1005_v23, 0.0 }
 0x72a   :  { %v1011_v55 = vadd.f32 1e-05, %v1007_v54 }
 0x72c   :  { %v1333_v56 = vpop.eup %1332  ;;  %1334 = vrsqrt.f32 %v1011_v55  ;;  %vm1019_vm7 = vweird.f32 %v1011_v55 }
 0x72d   :  { %v1024_v57 = vmul.f32 %v1333_v56, %v1012_v52  ;;  %vm1030_vm1 = vweird.f32 %v1333_v56 }
 0x72e   :  { %vm1031_vm5 = vmor %vm1029_vm4, %vm1030_vm1 }
 0x72f   :  { %v1025_v58 = vmul.f32 %v1333_v56, %v1024_v57 }
 0x731   :  { %v1026_v59 = vmul.f32 0.5, %v1025_v58 }
 0x732   :  { %v1335_v60 = vpop.eup %1334 }
 0x733   :  { %v1027_v61 = vsub.f32 1.5, %v1026_v59  ;;  %v1014_v63 = vmul.f32 %v1335_v60, %v1011_v55  ;;  %vm1020_vm6 = vweird.f32 %v1335_v60 }
 0x734   :  { %vm1021_vm8 = vmor %vm1019_vm7, %vm1020_vm6 }
 0x735   :  { %v1028_v0 = vmul.f32 %v1333_v56, %v1027_v61  ;;  %v1015_v3 = vmul.f32 %v1335_v60, %v1014_v63 }
 0x737   :  { %v1032_v4 = vsel %vm1031_vm5, %v1333_v56, %v1028_v0  ;;  %v1016_v8 = vmul.f32 0.5, %v1015_v3 }
 0x738   :  { %v1034_v9 = vmul.f32 %v1032_v4, %v1010_v5 }
 0x739   :  { %v1017_v10 = vsub.f32 1.5, %v1016_v8 }
 0x73a   :  { %v1036_v11 = vmax.f32 %v1034_v9, 0.0 }
 0x73b   :  { %v1018_v13 = vmul.f32 %v1335_v60, %v1017_v10 }
 0x73c   :  { %v1043_v15 = vrot.slane %v1036_v11, 4 }
 0x73d   :  { %v1022_v16 = vsel %vm1021_vm8, %v1335_v60, %v1018_v13 }
 0x73e   :  { %v1033_v1 = vmul.f32 %v1022_v16, %v1009_v14  ;;  %v1044_v18 = vmax.f32 %v1036_v11, %v1043_v15 }
 0x740   :  { %v1035_v19 = vmax.f32 %v1033_v1, 0.0  ;;  %v1045_v2 = vrot.slane %v1044_v18, 2 }
 0x742   :  { %v1037_v6 = vrot.slane %v1035_v19, 4  ;;  %v1046_v17 = vmax.f32 %v1044_v18, %v1045_v2 }
 0x744   :  { %v1038_v7 = vmax.f32 %v1035_v19, %v1037_v6  ;;  %v1047_v12 = vrot.slane %v1046_v17, 1 }
 0x746   :  { %v1039_v24 = vrot.slane %v1038_v7, 2  ;;  %v1048_v26 = vmax.f32 %v1046_v17, %v1047_v12 }
 0x748   :  { %v1040_v25 = vmax.f32 %v1038_v7, %v1039_v24  ;;  %v1055_v29 = vrot.slane %v1048_v26, 7 }
 0x74a   :  { %v1041_v27 = vrot.slane %v1040_v25, 1 }
 0x74c   :  { %v1042_v28 = vmax.f32 %v1040_v25, %v1041_v27 }
 0x74e   :  { %v1056_v62 = vsel %vm375_vm14, %v1055_v29, %v1042_v28 }
 0x74f   :  { %v1058_v30 = vsel %vm1057_vm9, %v1055_v29, %v1056_v62 }
 0x750   :  { %v1060_v31 = vsel %vm1059_vm10, %v1055_v29, %v1058_v30 }
 0x751   :  { %v1062_v32 = vsel %vm1061_vm11, %v1055_v29, %v1060_v31 }
 0x752   :  { %1064 = vst [vmem:[#allocation2] sm:$0x3] %v1062_v32 }
 0x753   :  { %1065 = vst [vmem:[#allocation2 + $0x2] sm:$0x3] %v1062_v32 }
 0x754   :  { %1076 = dma.vmem_to_hbm [thread:$0]  %s1072_s19, 64, %s1074_s22, [#allocation3]  }
 0x755   :  { %1361 = dma.done.wait [#allocation3], 64  }
 0x756   :  { %1362 = vsyncadd [#allocation3], 4294967232 }
 0x757   :  { %1081 = vsyncpa [#allocation3], 1 }

</bundles_post_ra>
